<compile_context>
chip_gen: v7x
topology: tpu7x:2x2x1
jax: 0.10.0
libtpu: 0.0.40
codegen_flags: <defaults>
</compile_context>

<pallas_src>
import functools

import jax
import jax.numpy as jnp
from jax.experimental import pallas as pl
from jax.experimental.pallas import tpu as pltpu


def _round_up(x, m):
    return ((x + m - 1) // m) * m


def _vit_block_kernel(
    x_ref,
    ln1_w_ref, ln1_b_ref,
    wq_ref, bq_ref, wkv_ref, bkv_ref,
    wproj_ref, bproj_ref, g1_ref,
    ln2_w_ref, ln2_b_ref,
    w1_ref, b1_ref, w2_ref, b2_ref, g2_ref,
    o_ref,
    *, num_heads, eps, n_valid, use_attention, use_mlp, approx_gelu,
):
    n_pad, d = x_ref.shape          # all (padded) tokens of this batch element
    tq, _ = o_ref.shape             # query tile owned by this grid point
    h = num_heads
    hd = d // h
    single_tile = (tq == n_pad)

    def layer_norm(y, w, b):
        mu = jnp.mean(y, axis=-1, keepdims=True)
        var = jnp.mean(jnp.square(y - mu), axis=-1, keepdims=True)
        return (y - mu) * jax.lax.rsqrt(var + eps) * w + b

    # residual-stream rows owned by this (batch, query-tile) grid point
    if single_tile:
        x_q = x_ref[...].astype(jnp.float32)
    else:
        q0 = pl.multiple_of(pl.program_id(1) * tq, tq)
        x_q = x_ref[pl.ds(q0, tq), :].astype(jnp.float32)

    # ----------------- attention branch: x + ls1(attn(norm1(x))) -----------------
    if use_attention:
        ln1_w = ln1_w_ref[...]
        ln1_b = ln1_b_ref[...]
        xn_q = layer_norm(x_q, ln1_w, ln1_b)                                # (tq, d)
        if single_tile:
            xn_all = xn_q
        else:
            xn_all = layer_norm(x_ref[...].astype(jnp.float32), ln1_w, ln1_b)

        # Fused, lane-dense projections (bf16 operands, f32 accumulation).
        # 1/sqrt(head_dim) is already folded into wq / bq at parameter-prep time.
        q = jnp.dot(xn_q.astype(jnp.bfloat16), wq_ref[...],
                    preferred_element_type=jnp.float32) + bq_ref[...]       # (tq, d)
        kv = jnp.dot(xn_all.astype(jnp.bfloat16), wkv_ref[...],
                     preferred_element_type=jnp.float32) + bkv_ref[...]     # (n, 2d)

        # one-time head-split relayout (no H copies of the normalized input)
        q_h = jnp.transpose(q.reshape(tq, h, hd), (1, 0, 2)).astype(jnp.bfloat16)
        k_h = jnp.transpose(kv[:, :d].reshape(n_pad, h, hd), (1, 0, 2)).astype(jnp.bfloat16)
        v_h = jnp.transpose(kv[:, d:].reshape(n_pad, h, hd), (1, 0, 2)).astype(jnp.bfloat16)

        # scores: 'hqc,hkc->hqk'
        s = jax.lax.dot_general(q_h, k_h, (((2,), (2,)), ((0,), (0,))),
                                preferred_element_type=jnp.float32)         # (h,tq,n)
        if n_valid < n_pad:          # mask padded key tokens
            key_idx = jax.lax.broadcasted_iota(jnp.int32, s.shape, 2)
            s = jnp.where(key_idx < n_valid, s, -1e30)
        s = s - jnp.max(s, axis=-1, keepdims=True)
        p = jnp.exp(s)
        p = p * pl.reciprocal(jnp.sum(p, axis=-1, keepdims=True), approx=True)

        # context: 'hqk,hkc->hqc'
        ctx = jax.lax.dot_general(p.astype(jnp.bfloat16), v_h,
                                  (((2,), (1,)), ((0,), (0,))),
                                  preferred_element_type=jnp.float32)       # (h,tq,hd)

        # merge heads and do ONE lane-dense output projection (no per-head matmuls,
        # no (H, N, D) f32 temp, no cross-head VPU reduce).
        ctx = jnp.transpose(ctx, (1, 0, 2)).reshape(tq, d)
        o = jnp.dot(ctx.astype(jnp.bfloat16), wproj_ref[...],
                    preferred_element_type=jnp.float32) + bproj_ref[...]    # (tq, d)
        x_q = x_q + o * g1_ref[...]                                         # ls1

    # ----------------- MLP branch: x + ls2(mlp(norm2(x))) ------------------------
    if use_mlp:
        xn2 = layer_norm(x_q, ln2_w_ref[...], ln2_b_ref[...]).astype(jnp.bfloat16)
        hmid = jnp.dot(xn2, w1_ref[...],
                       preferred_element_type=jnp.float32) + b1_ref[...]    # (tq, Hm)
        hmid = jax.nn.gelu(hmid, approximate=approx_gelu)
        m = jnp.dot(hmid.astype(jnp.bfloat16), w2_ref[...],
                    preferred_element_type=jnp.float32) + b2_ref[...]       # (tq, d)
        x_q = x_q + m * g2_ref[...]                                         # ls2

    o_ref[...] = x_q.astype(o_ref.dtype)


def prepare_params(p, num_heads):
    """One-time (offline) parameter transform for the kernel:
       - split qkv into a Q weight (attention scale folded in) and a fused [K|V]
         weight so every projection is a single full-width matmul,
       - cast matmul weights to bf16 (biases / LN / LayerScale stay f32)."""
    d = p["ln1_w"].shape[-1]
    hd = d // num_heads
    scale = float(hd) ** -0.5
    bf16, f32 = jnp.bfloat16, jnp.float32

    wqkv = p["wqkv_t"]              # (d, 3d), output columns ordered [q | k | v]
    bqkv = p["bqkv"]                # (1, 3d)
    return {
        "ln1_w": p["ln1_w"].astype(f32), "ln1_b": p["ln1_b"].astype(f32),
        "wq": (wqkv[:, :d] * scale).astype(bf16),
        "bq": (bqkv[:, :d] * scale).astype(f32),
        "wkv": wqkv[:, d:].astype(bf16),
        "bkv": bqkv[:, d:].astype(f32),
        "wproj": p["wproj_t"].astype(bf16), "bproj": p["bproj"].astype(f32),
        "g1": p["g1"].astype(f32),
        "ln2_w": p["ln2_w"].astype(f32), "ln2_b": p["ln2_b"].astype(f32),
        "w1": p["w1"].astype(bf16), "b1": p["b1"].astype(f32),
        "w2": p["w2"].astype(bf16), "b2": p["b2"].astype(f32),
        "g2": p["g2"].astype(f32),
    }


def _vmem_limit_bytes():
    """Generation-aware scoped-VMEM budget: ~3/4 of physical VMEM, capped at 96 MiB
       (-> ~48 MiB on v7x's 64 MiB, ~96 MiB on v5e/v6e's 128 MiB)."""
    cap = 128 * 1024 * 1024
    try:
        cap = int(getattr(pltpu.get_tpu_info(), "vmem_capacity_bytes", cap))
    except Exception:
        pass
    return int(max(32 * 1024 * 1024, min(3 * cap // 4, 96 * 1024 * 1024)))


def vit_block_pallas(x, prep, *, num_heads, eps=1e-6, use_attention=True,
                     use_mlp=True, q_tile_tokens=None, approx_gelu=True):
    B, N, D = x.shape

    # Pad the token dim to a sublane/tile-friendly size (pad keys are masked in
    # the kernel) instead of passing a ragged N into the kernel.
    if q_tile_tokens is None:
        tq = _round_up(N, 8)
        n_pad = tq
    else:
        tq = _round_up(min(q_tile_tokens, _round_up(N, 8)), 8)
        n_pad = _round_up(N, tq)
    n_q_tiles = n_pad // tq
    x_p = x if n_pad == N else jnp.pad(x, ((0, 0), (0, n_pad - N), (0, 0)))

    operands = (
        x_p,
        prep["ln1_w"], prep["ln1_b"],
        prep["wq"], prep["bq"], prep["wkv"], prep["bkv"],
        prep["wproj"], prep["bproj"], prep["g1"],
        prep["ln2_w"], prep["ln2_b"],
        prep["w1"], prep["b1"], prep["w2"], prep["b2"], prep["g2"],
    )

    def resident(arr):
        # grid-invariant operand: full-array block, single-buffered (don't
        # double-buffer weights that never change across the grid).
        nd = arr.ndim
        return pl.BlockSpec(arr.shape, lambda b, t, _nd=nd: (0,) * _nd,
                            pipeline_mode=pl.Buffered(1))

    in_specs = [pl.BlockSpec((None, n_pad, D), lambda b, t: (b, 0, 0))]
    in_specs += [resident(a) for a in operands[1:]]
    out_specs = pl.BlockSpec((None, tq, D), lambda b, t: (b, t, 0))

    # Advisory cost estimate so XLA can schedule surrounding ops around this call.
    hm = prep["w1"].shape[-1]
    flops = trans = 0
    if use_attention:
        flops += B * (2 * n_pad * D * D                   # Q projection
                      + n_q_tiles * 4 * n_pad * D * D     # K|V projection (per q tile)
                      + 4 * n_pad * n_pad * D             # scores + PV
                      + 2 * n_pad * D * D)                # output projection
        trans += B * num_heads * n_pad * n_pad
    if use_mlp:
        flops += B * 4 * n_pad * D * hm
        trans += B * n_pad * hm
    bytes_accessed = 2 * B * n_pad * D * x.dtype.itemsize + sum(
        int(a.size) * a.dtype.itemsize for a in operands[1:])

    kernel = functools.partial(
        _vit_block_kernel, num_heads=num_heads, eps=eps, n_valid=N,
        use_attention=use_attention, use_mlp=use_mlp, approx_gelu=approx_gelu)

    out = pl.pallas_call(
        kernel,
        out_shape=jax.ShapeDtypeStruct((B, n_pad, D), x.dtype),
        grid=(B, n_q_tiles),
        in_specs=in_specs,
        out_specs=out_specs,
        compiler_params=pltpu.CompilerParams(
            # batch elements and query tiles are independent -> both "parallel"
            # (keeps v7x's second TensorCore busy even at batch 1).
            dimension_semantics=("parallel", "parallel"),
            vmem_limit_bytes=_vmem_limit_bytes()),
        cost_estimate=pl.CostEstimate(flops=int(flops), transcendentals=int(trans),
                                      bytes_accessed=int(bytes_accessed)),
    )(*operands)

    return out if n_pad == N else out[:, :N, :]


def vit_block_ref(x, p, *, num_heads, eps=1e-6, use_attention=True, use_mlp=True):
    """Pure-JAX f32 reference mirroring the timm Block forward (exact GELU)."""
    def ln(y, w, b):
        mu = y.mean(-1, keepdims=True)
        var = ((y - mu) ** 2).mean(-1, keepdims=True)
        return (y - mu) / jnp.sqrt(var + eps) * w + b

    B, N, D = x.shape
    hd = D // num_heads
    if use_attention:
        xn = ln(x, p["ln1_w"][0], p["ln1_b"][0])
        qkv = xn @ p["wqkv_t"] + p["bqkv"][0]
        qkv = qkv.reshape(B, N, 3, num_heads, hd).transpose(2, 0, 3, 1, 4)
        q, k, v = qkv[0], qkv[1], qkv[2]                      # (B, H, N, hd)
        a = jax.nn.softmax((q * hd ** -0.5) @ k.transpose(0, 1, 3, 2), axis=-1)
        o = (a @ v).transpose(0, 2, 1, 3).reshape(B, N, D)
        o = o @ p["wproj_t"] + p["bproj"][0]
        x = x + o * p["g1"][0]
    if use_mlp:
        xn2 = ln(x, p["ln2_w"][0], p["ln2_b"][0])
        h = jax.nn.gelu(xn2 @ p["w1"] + p["b1"][0], approximate=False)
        x = x + (h @ p["w2"] + p["b2"][0]) * p["g2"][0]
    return x


def make_params(key, dim, num_heads, mlp_hidden):
    ks = jax.random.split(key, 8)
    s = 0.05
    return {
        "ln1_w": jnp.ones((1, dim), jnp.float32),
        "ln1_b": jnp.zeros((1, dim), jnp.float32),
        "wqkv_t": s * jax.random.normal(ks[0], (dim, 3 * dim), jnp.float32),
        "bqkv": s * jax.random.normal(ks[1], (1, 3 * dim), jnp.float32),
        "wproj_t": s * jax.random.normal(ks[2], (dim, dim), jnp.float32),
        "bproj": s * jax.random.normal(ks[3], (1, dim), jnp.float32),
        "g1": 0.1 * jnp.ones((1, dim), jnp.float32),          # LayerScale ls1
        "ln2_w": jnp.ones((1, dim), jnp.float32),
        "ln2_b": jnp.zeros((1, dim), jnp.float32),
        "w1": s * jax.random.normal(ks[4], (dim, mlp_hidden), jnp.float32),
        "b1": s * jax.random.normal(ks[5], (1, mlp_hidden), jnp.float32),
        "w2": s * jax.random.normal(ks[6], (mlp_hidden, dim), jnp.float32),
        "b2": s * jax.random.normal(ks[7], (1, dim), jnp.float32),
        "g2": 0.1 * jnp.ones((1, dim), jnp.float32),          # LayerScale ls2
    }


if __name__ == "__main__":
    B, N, D = 2, 12, 64          # batch, tokens (ragged -> padded to 16), embed dim
    num_heads = 4                # head_dim = 16
    mlp_hidden = 4 * D           # mlp_ratio = 4

    key = jax.random.PRNGKey(0)
    kx, kp = jax.random.split(key)
    x = jax.random.normal(kx, (B, N, D), jnp.float32)
    params = make_params(kp, D, num_heads, mlp_hidden)
    prep = prepare_params(params, num_heads)      # one-time offline weight prep

    configs = [
        dict(use_attention=True,  use_mlp=True,  q_tile_tokens=None),  # 1 query tile
        dict(use_attention=True,  use_mlp=True,  q_tile_tokens=8),     # 2 tiles + pad mask
        dict(use_attention=True,  use_mlp=False, q_tile_tokens=8),     # pruned MLP
        dict(use_attention=False, use_mlp=True,  q_tile_tokens=None),  # pruned attention
    ]
    for cfg in configs:
        out = vit_block_pallas(x, prep, num_heads=num_heads, **cfg)
        out = jax.block_until_ready(out)
        ref = vit_block_ref(x, params, num_heads=num_heads,
                            use_attention=cfg["use_attention"],
                            use_mlp=cfg["use_mlp"])
        assert out.shape == (B, N, D)
        err = float(jnp.max(jnp.abs(out - ref)))
        # bf16 matmul operands + approx softmax reciprocal + tanh GELU -> relaxed tol
        assert err < 2e-2, f"{cfg}: max abs err {err}"
    print("KERNEL_OK")
</pallas_src>

<mosaic_0001>
module attributes {stable_mosaic.version = 11 : i64} {
  func.func @_vit_block_kernel(%arg0: i32, %arg1: i32, %arg2: memref<1x16x64xf32, #tpu.memory_space<vmem>>, %arg3: memref<1x64xf32, #tpu.memory_space<vmem>>, %arg4: memref<1x64xf32, #tpu.memory_space<vmem>>, %arg5: memref<64x64xbf16, #tpu.memory_space<vmem>>, %arg6: memref<1x64xf32, #tpu.memory_space<vmem>>, %arg7: memref<64x128xbf16, #tpu.memory_space<vmem>>, %arg8: memref<1x128xf32, #tpu.memory_space<vmem>>, %arg9: memref<64x64xbf16, #tpu.memory_space<vmem>>, %arg10: memref<1x64xf32, #tpu.memory_space<vmem>>, %arg11: memref<1x64xf32, #tpu.memory_space<vmem>>, %arg12: memref<1x64xf32, #tpu.memory_space<vmem>>, %arg13: memref<1x64xf32, #tpu.memory_space<vmem>>, %arg14: memref<64x256xbf16, #tpu.memory_space<vmem>>, %arg15: memref<1x256xf32, #tpu.memory_space<vmem>>, %arg16: memref<256x64xbf16, #tpu.memory_space<vmem>>, %arg17: memref<1x64xf32, #tpu.memory_space<vmem>>, %arg18: memref<1x64xf32, #tpu.memory_space<vmem>>, %arg19: memref<1x16x64xf32, #tpu.memory_space<vmem>>) attributes {dimension_semantics = [#tpu.dimension_semantics<parallel>, #tpu.dimension_semantics<parallel>], iteration_bounds = array<i64: 2, 1>, scalar_prefetch = 0 : i64, scratch_operands = 0 : i64, tpu.core_type = #tpu.core_type<tc>, window_params = [{transform_indices = @transform_0, window_bounds = array<i64: 1, 16, 64>}, {pipeline_mode = #tpu.pipeline_mode<synchronous>, transform_indices = @transform_1, window_bounds = array<i64: 1, 64>}, {pipeline_mode = #tpu.pipeline_mode<synchronous>, transform_indices = @transform_2, window_bounds = array<i64: 1, 64>}, {pipeline_mode = #tpu.pipeline_mode<synchronous>, transform_indices = @transform_3, window_bounds = array<i64: 64, 64>}, {pipeline_mode = #tpu.pipeline_mode<synchronous>, transform_indices = @transform_4, window_bounds = array<i64: 1, 64>}, {pipeline_mode = #tpu.pipeline_mode<synchronous>, transform_indices = @transform_5, window_bounds = array<i64: 64, 128>}, {pipeline_mode = #tpu.pipeline_mode<synchronous>, transform_indices = @transform_6, window_bounds = array<i64: 1, 128>}, {pipeline_mode = #tpu.pipeline_mode<synchronous>, transform_indices = @transform_7, window_bounds = array<i64: 64, 64>}, {pipeline_mode = #tpu.pipeline_mode<synchronous>, transform_indices = @transform_8, window_bounds = array<i64: 1, 64>}, {pipeline_mode = #tpu.pipeline_mode<synchronous>, transform_indices = @transform_9, window_bounds = array<i64: 1, 64>}, {pipeline_mode = #tpu.pipeline_mode<synchronous>, transform_indices = @transform_10, window_bounds = array<i64: 1, 64>}, {pipeline_mode = #tpu.pipeline_mode<synchronous>, transform_indices = @transform_11, window_bounds = array<i64: 1, 64>}, {pipeline_mode = #tpu.pipeline_mode<synchronous>, transform_indices = @transform_12, window_bounds = array<i64: 64, 256>}, {pipeline_mode = #tpu.pipeline_mode<synchronous>, transform_indices = @transform_13, window_bounds = array<i64: 1, 256>}, {pipeline_mode = #tpu.pipeline_mode<synchronous>, transform_indices = @transform_14, window_bounds = array<i64: 256, 64>}, {pipeline_mode = #tpu.pipeline_mode<synchronous>, transform_indices = @transform_15, window_bounds = array<i64: 1, 64>}, {pipeline_mode = #tpu.pipeline_mode<synchronous>, transform_indices = @transform_16, window_bounds = array<i64: 1, 64>}, {transform_indices = @transform_17, window_bounds = array<i64: 1, 16, 64>}]} {
    %c0 = arith.constant 0 : index
    %c0_0 = arith.constant 0 : index
    %c0_1 = arith.constant 0 : index
    %0 = vector.load %arg2[%c0, %c0_0, %c0_1] : memref<1x16x64xf32, #tpu.memory_space<vmem>>, vector<1x16x64xf32>
    %1 = vector.shape_cast %0 : vector<1x16x64xf32> to vector<16x64xf32>
    %c0_2 = arith.constant 0 : index
    %c0_3 = arith.constant 0 : index
    %2 = vector.load %arg3[%c0_2, %c0_3] : memref<1x64xf32, #tpu.memory_space<vmem>>, vector<1x64xf32>
    %c0_4 = arith.constant 0 : index
    %c0_5 = arith.constant 0 : index
    %3 = vector.load %arg4[%c0_4, %c0_5] : memref<1x64xf32, #tpu.memory_space<vmem>>, vector<1x64xf32>
    %cst = arith.constant dense<0.000000e+00> : vector<16xf32>
    %4 = vector.multi_reduction <add>, %1, %cst [1] : vector<16x64xf32> to vector<16xf32>
    %5 = vector.shape_cast %4 : vector<16xf32> to vector<16x1xf32>
    %cst_6 = arith.constant 6.400000e+01 : f32
    %6 = vector.broadcast %cst_6 : f32 to vector<16x1xf32>
    %7 = arith.divf %5, %6 : vector<16x1xf32>
    %8 = vector.broadcast %7 : vector<16x1xf32> to vector<16x64xf32>
    %9 = arith.subf %1, %8 : vector<16x64xf32>
    %10 = arith.mulf %9, %9 : vector<16x64xf32>
    %cst_7 = arith.constant dense<0.000000e+00> : vector<16xf32>
    %11 = vector.multi_reduction <add>, %10, %cst_7 [1] : vector<16x64xf32> to vector<16xf32>
    %12 = vector.shape_cast %11 : vector<16xf32> to vector<16x1xf32>
    %cst_8 = arith.constant 6.400000e+01 : f32
    %13 = vector.broadcast %cst_8 : f32 to vector<16x1xf32>
    %14 = arith.divf %12, %13 : vector<16x1xf32>
    %15 = vector.broadcast %7 : vector<16x1xf32> to vector<16x64xf32>
    %16 = arith.subf %1, %15 : vector<16x64xf32>
    %cst_9 = arith.constant 9.99999997E-7 : f32
    %17 = vector.broadcast %cst_9 : f32 to vector<16x1xf32>
    %18 = arith.addf %14, %17 : vector<16x1xf32>
    %19 = math.rsqrt %18 : vector<16x1xf32>
    %20 = vector.broadcast %19 : vector<16x1xf32> to vector<16x64xf32>
    %21 = arith.mulf %16, %20 : vector<16x64xf32>
    %22 = vector.broadcast %2 : vector<1x64xf32> to vector<16x64xf32>
    %23 = arith.mulf %21, %22 : vector<16x64xf32>
    %24 = vector.broadcast %3 : vector<1x64xf32> to vector<16x64xf32>
    %25 = arith.addf %23, %24 : vector<16x64xf32>
    %26 = arith.truncf %25 : vector<16x64xf32> to vector<16x64xbf16>
    %c0_10 = arith.constant 0 : index
    %c0_11 = arith.constant 0 : index
    %27 = vector.load %arg5[%c0_10, %c0_11] : memref<64x64xbf16, #tpu.memory_space<vmem>>, vector<64x64xbf16>
    %cst_12 = arith.constant dense<0.000000e+00> : vector<16x64xf32>
    %28 = tpu.matmul %26, %27, %cst_12 {dimension_numbers = #tpu.dot_dimension_numbers<[1], [0], [0], [1], [0, 0, 1, 1], [], []>} : vector<16x64xbf16>, vector<64x64xbf16>, vector<16x64xf32> -> vector<16x64xf32>
    %c0_13 = arith.constant 0 : index
    %c0_14 = arith.constant 0 : index
    %29 = vector.load %arg6[%c0_13, %c0_14] : memref<1x64xf32, #tpu.memory_space<vmem>>, vector<1x64xf32>
    %30 = vector.broadcast %29 : vector<1x64xf32> to vector<16x64xf32>
    %31 = arith.addf %28, %30 : vector<16x64xf32>
    %32 = arith.truncf %25 : vector<16x64xf32> to vector<16x64xbf16>
    %c0_15 = arith.constant 0 : index
    %c0_16 = arith.constant 0 : index
    %33 = vector.load %arg7[%c0_15, %c0_16] : memref<64x128xbf16, #tpu.memory_space<vmem>>, vector<64x128xbf16>
    %cst_17 = arith.constant dense<0.000000e+00> : vector<16x128xf32>
    %34 = tpu.matmul %32, %33, %cst_17 {dimension_numbers = #tpu.dot_dimension_numbers<[1], [0], [0], [1], [0, 0, 1, 1], [], []>} : vector<16x64xbf16>, vector<64x128xbf16>, vector<16x128xf32> -> vector<16x128xf32>
    %c0_18 = arith.constant 0 : index
    %c0_19 = arith.constant 0 : index
    %35 = vector.load %arg8[%c0_18, %c0_19] : memref<1x128xf32, #tpu.memory_space<vmem>>, vector<1x128xf32>
    %36 = vector.broadcast %35 : vector<1x128xf32> to vector<16x128xf32>
    %37 = arith.addf %34, %36 : vector<16x128xf32>
    %38 = vector.shape_cast %31 : vector<16x64xf32> to vector<16x4x16xf32>
    %39 = tpu.transpose %38, [1, 0, 2] : vector<16x4x16xf32> -> vector<4x16x16xf32>
    %40 = arith.truncf %39 : vector<4x16x16xf32> to vector<4x16x16xbf16>
    %41 = vector.extract_strided_slice %37 {offsets = [0, 0], sizes = [16, 64], strides = [1, 1]} : vector<16x128xf32> to vector<16x64xf32>
    %42 = vector.shape_cast %41 : vector<16x64xf32> to vector<16x4x16xf32>
    %43 = tpu.transpose %42, [1, 0, 2] : vector<16x4x16xf32> -> vector<4x16x16xf32>
    %44 = arith.truncf %43 : vector<4x16x16xf32> to vector<4x16x16xbf16>
    %45 = vector.extract_strided_slice %37 {offsets = [0, 64], sizes = [16, 64], strides = [1, 1]} : vector<16x128xf32> to vector<16x64xf32>
    %46 = vector.shape_cast %45 : vector<16x64xf32> to vector<16x4x16xf32>
    %47 = tpu.transpose %46, [1, 0, 2] : vector<16x4x16xf32> -> vector<4x16x16xf32>
    %48 = arith.truncf %47 : vector<4x16x16xf32> to vector<4x16x16xbf16>
    %cst_20 = arith.constant dense<0.000000e+00> : vector<4x16x16xf32>
    %49 = tpu.matmul %40, %44, %cst_20 {dimension_numbers = #tpu.dot_dimension_numbers<[2], [2], [1], [1], [0, 0, 0, 1, 1, 1], [0], [0]>} : vector<4x16x16xbf16>, vector<4x16x16xbf16>, vector<4x16x16xf32> -> vector<4x16x16xf32>
    %50 = tpu.iota {dimensions = array<i32: 2>} : vector<4x16x16xi32>
    %c12_i32 = arith.constant 12 : i32
    %51 = vector.broadcast %c12_i32 : i32 to vector<4x16x16xi32>
    %52 = arith.cmpi slt, %50, %51 : vector<4x16x16xi32>
    %cst_21 = arith.constant -1.000000e+30 : f32
    %53 = vector.broadcast %cst_21 : f32 to vector<4x16x16xf32>
    %54 = arith.select %52, %49, %53 : vector<4x16x16xi1>, vector<4x16x16xf32>
    %cst_22 = arith.constant dense<0xFF800000> : vector<4x16xf32>
    %55 = vector.multi_reduction <maximumf>, %54, %cst_22 [2] : vector<4x16x16xf32> to vector<4x16xf32>
    %56 = vector.shape_cast %55 : vector<4x16xf32> to vector<4x16x1xf32>
    %57 = vector.broadcast %56 : vector<4x16x1xf32> to vector<4x16x16xf32>
    %58 = arith.subf %54, %57 : vector<4x16x16xf32>
    %59 = math.exp %58 : vector<4x16x16xf32>
    %cst_23 = arith.constant dense<0.000000e+00> : vector<4x16xf32>
    %60 = vector.multi_reduction <add>, %59, %cst_23 [2] : vector<4x16x16xf32> to vector<4x16xf32>
    %61 = vector.shape_cast %60 : vector<4x16xf32> to vector<4x16x1xf32>
    %62 = tpu.reciprocal %61 {approx = true} : vector<4x16x1xf32> -> vector<4x16x1xf32>
    %63 = vector.broadcast %62 : vector<4x16x1xf32> to vector<4x16x16xf32>
    %64 = arith.mulf %59, %63 : vector<4x16x16xf32>
    %65 = arith.truncf %64 : vector<4x16x16xf32> to vector<4x16x16xbf16>
    %cst_24 = arith.constant dense<0.000000e+00> : vector<4x16x16xf32>
    %66 = tpu.matmul %65, %48, %cst_24 {dimension_numbers = #tpu.dot_dimension_numbers<[2], [1], [1], [2], [0, 0, 0, 1, 1, 2], [0], [0]>} : vector<4x16x16xbf16>, vector<4x16x16xbf16>, vector<4x16x16xf32> -> vector<4x16x16xf32>
    %67 = tpu.transpose %66, [1, 0, 2] : vector<4x16x16xf32> -> vector<16x4x16xf32>
    %68 = vector.shape_cast %67 : vector<16x4x16xf32> to vector<16x64xf32>
    %69 = arith.truncf %68 : vector<16x64xf32> to vector<16x64xbf16>
    %c0_25 = arith.constant 0 : index
    %c0_26 = arith.constant 0 : index
    %70 = vector.load %arg9[%c0_25, %c0_26] : memref<64x64xbf16, #tpu.memory_space<vmem>>, vector<64x64xbf16>
    %cst_27 = arith.constant dense<0.000000e+00> : vector<16x64xf32>
    %71 = tpu.matmul %69, %70, %cst_27 {dimension_numbers = #tpu.dot_dimension_numbers<[1], [0], [0], [1], [0, 0, 1, 1], [], []>} : vector<16x64xbf16>, vector<64x64xbf16>, vector<16x64xf32> -> vector<16x64xf32>
    %c0_28 = arith.constant 0 : index
    %c0_29 = arith.constant 0 : index
    %72 = vector.load %arg10[%c0_28, %c0_29] : memref<1x64xf32, #tpu.memory_space<vmem>>, vector<1x64xf32>
    %73 = vector.broadcast %72 : vector<1x64xf32> to vector<16x64xf32>
    %74 = arith.addf %71, %73 : vector<16x64xf32>
    %c0_30 = arith.constant 0 : index
    %c0_31 = arith.constant 0 : index
    %75 = vector.load %arg11[%c0_30, %c0_31] : memref<1x64xf32, #tpu.memory_space<vmem>>, vector<1x64xf32>
    %76 = vector.broadcast %75 : vector<1x64xf32> to vector<16x64xf32>
    %77 = arith.mulf %74, %76 : vector<16x64xf32>
    %78 = arith.addf %1, %77 : vector<16x64xf32>
    %c0_32 = arith.constant 0 : index
    %c0_33 = arith.constant 0 : index
    %79 = vector.load %arg12[%c0_32, %c0_33] : memref<1x64xf32, #tpu.memory_space<vmem>>, vector<1x64xf32>
    %c0_34 = arith.constant 0 : index
    %c0_35 = arith.constant 0 : index
    %80 = vector.load %arg13[%c0_34, %c0_35] : memref<1x64xf32, #tpu.memory_space<vmem>>, vector<1x64xf32>
    %cst_36 = arith.constant dense<0.000000e+00> : vector<16xf32>
    %81 = vector.multi_reduction <add>, %78, %cst_36 [1] : vector<16x64xf32> to vector<16xf32>
    %82 = vector.shape_cast %81 : vector<16xf32> to vector<16x1xf32>
    %cst_37 = arith.constant 6.400000e+01 : f32
    %83 = vector.broadcast %cst_37 : f32 to vector<16x1xf32>
    %84 = arith.divf %82, %83 : vector<16x1xf32>
    %85 = vector.broadcast %84 : vector<16x1xf32> to vector<16x64xf32>
    %86 = arith.subf %78, %85 : vector<16x64xf32>
    %87 = arith.mulf %86, %86 : vector<16x64xf32>
    %cst_38 = arith.constant dense<0.000000e+00> : vector<16xf32>
    %88 = vector.multi_reduction <add>, %87, %cst_38 [1] : vector<16x64xf32> to vector<16xf32>
    %89 = vector.shape_cast %88 : vector<16xf32> to vector<16x1xf32>
    %cst_39 = arith.constant 6.400000e+01 : f32
    %90 = vector.broadcast %cst_39 : f32 to vector<16x1xf32>
    %91 = arith.divf %89, %90 : vector<16x1xf32>
    %92 = vector.broadcast %84 : vector<16x1xf32> to vector<16x64xf32>
    %93 = arith.subf %78, %92 : vector<16x64xf32>
    %cst_40 = arith.constant 9.99999997E-7 : f32
    %94 = vector.broadcast %cst_40 : f32 to vector<16x1xf32>
    %95 = arith.addf %91, %94 : vector<16x1xf32>
    %96 = math.rsqrt %95 : vector<16x1xf32>
    %97 = vector.broadcast %96 : vector<16x1xf32> to vector<16x64xf32>
    %98 = arith.mulf %93, %97 : vector<16x64xf32>
    %99 = vector.broadcast %79 : vector<1x64xf32> to vector<16x64xf32>
    %100 = arith.mulf %98, %99 : vector<16x64xf32>
    %101 = vector.broadcast %80 : vector<1x64xf32> to vector<16x64xf32>
    %102 = arith.addf %100, %101 : vector<16x64xf32>
    %103 = arith.truncf %102 : vector<16x64xf32> to vector<16x64xbf16>
    %c0_41 = arith.constant 0 : index
    %c0_42 = arith.constant 0 : index
    %104 = vector.load %arg14[%c0_41, %c0_42] : memref<64x256xbf16, #tpu.memory_space<vmem>>, vector<64x256xbf16>
    %cst_43 = arith.constant dense<0.000000e+00> : vector<16x256xf32>
    %105 = tpu.matmul %103, %104, %cst_43 {dimension_numbers = #tpu.dot_dimension_numbers<[1], [0], [0], [1], [0, 0, 1, 1], [], []>} : vector<16x64xbf16>, vector<64x256xbf16>, vector<16x256xf32> -> vector<16x256xf32>
    %c0_44 = arith.constant 0 : index
    %c0_45 = arith.constant 0 : index
    %106 = vector.load %arg15[%c0_44, %c0_45] : memref<1x256xf32, #tpu.memory_space<vmem>>, vector<1x256xf32>
    %107 = vector.broadcast %106 : vector<1x256xf32> to vector<16x256xf32>
    %108 = arith.addf %105, %107 : vector<16x256xf32>
    %109 = arith.mulf %108, %108 : vector<16x256xf32>
    %110 = arith.mulf %108, %109 : vector<16x256xf32>
    %cst_46 = arith.constant 4.471500e-02 : f32
    %111 = vector.broadcast %cst_46 : f32 to vector<16x256xf32>
    %112 = arith.mulf %111, %110 : vector<16x256xf32>
    %113 = arith.addf %108, %112 : vector<16x256xf32>
    %cst_47 = arith.constant 0.797884583 : f32
    %114 = vector.broadcast %cst_47 : f32 to vector<16x256xf32>
    %115 = arith.mulf %114, %113 : vector<16x256xf32>
    %116 = math.tanh %115 : vector<16x256xf32>
    %cst_48 = arith.constant 1.000000e+00 : f32
    %117 = vector.broadcast %cst_48 : f32 to vector<16x256xf32>
    %118 = arith.addf %117, %116 : vector<16x256xf32>
    %cst_49 = arith.constant 5.000000e-01 : f32
    %119 = vector.broadcast %cst_49 : f32 to vector<16x256xf32>
    %120 = arith.mulf %119, %118 : vector<16x256xf32>
    %121 = arith.mulf %108, %120 : vector<16x256xf32>
    %122 = arith.truncf %121 : vector<16x256xf32> to vector<16x256xbf16>
    %c0_50 = arith.constant 0 : index
    %c0_51 = arith.constant 0 : index
    %123 = vector.load %arg16[%c0_50, %c0_51] : memref<256x64xbf16, #tpu.memory_space<vmem>>, vector<256x64xbf16>
    %cst_52 = arith.constant dense<0.000000e+00> : vector<16x64xf32>
    %124 = tpu.matmul %122, %123, %cst_52 {dimension_numbers = #tpu.dot_dimension_numbers<[1], [0], [0], [1], [0, 0, 1, 1], [], []>} : vector<16x256xbf16>, vector<256x64xbf16>, vector<16x64xf32> -> vector<16x64xf32>
    %c0_53 = arith.constant 0 : index
    %c0_54 = arith.constant 0 : index
    %125 = vector.load %arg17[%c0_53, %c0_54] : memref<1x64xf32, #tpu.memory_space<vmem>>, vector<1x64xf32>
    %126 = vector.broadcast %125 : vector<1x64xf32> to vector<16x64xf32>
    %127 = arith.addf %124, %126 : vector<16x64xf32>
    %c0_55 = arith.constant 0 : index
    %c0_56 = arith.constant 0 : index
    %128 = vector.load %arg18[%c0_55, %c0_56] : memref<1x64xf32, #tpu.memory_space<vmem>>, vector<1x64xf32>
    %129 = vector.broadcast %128 : vector<1x64xf32> to vector<16x64xf32>
    %130 = arith.mulf %127, %129 : vector<16x64xf32>
    %131 = arith.addf %78, %130 : vector<16x64xf32>
    %c0_57 = arith.constant 0 : index
    %c0_58 = arith.constant 0 : index
    %c0_59 = arith.constant 0 : index
    %132 = vector.load %arg19[%c0_57, %c0_58, %c0_59] : memref<1x16x64xf32, #tpu.memory_space<vmem>>, vector<1x16x64xf32>
    %133 = vector.shape_cast %132 : vector<1x16x64xf32> to vector<16x64xf32>
    %134 = vector.shape_cast %131 : vector<16x64xf32> to vector<1x16x64xf32>
    tpu.vector_store %arg19[%c0_57, %c0_58, %c0_59], %134 {strides = array<i32>} : memref<1x16x64xf32, #tpu.memory_space<vmem>>, vector<1x16x64xf32>,
    return
  }
  func.func @transform_0(%arg0: i32, %arg1: i32) -> (i32, i32, i32) {
    %c0_i32 = arith.constant 0 : i32
    %c0_i32_0 = arith.constant 0 : i32
    %c0_i32_1 = arith.constant 0 : i32
    return %arg0, %c0_i32, %c0_i32_0 : i32, i32, i32
  }
  func.func @transform_1(%arg0: i32, %arg1: i32) -> (i32, i32) {
    %c0_i32 = arith.constant 0 : i32
    %c0_i32_0 = arith.constant 0 : i32
    %c0_i32_1 = arith.constant 0 : i32
    return %c0_i32, %c0_i32_0 : i32, i32
  }
  func.func @transform_2(%arg0: i32, %arg1: i32) -> (i32, i32) {
    %c0_i32 = arith.constant 0 : i32
    %c0_i32_0 = arith.constant 0 : i32
    %c0_i32_1 = arith.constant 0 : i32
    return %c0_i32, %c0_i32_0 : i32, i32
  }
  func.func @transform_3(%arg0: i32, %arg1: i32) -> (i32, i32) {
    %c0_i32 = arith.constant 0 : i32
    %c0_i32_0 = arith.constant 0 : i32
    %c0_i32_1 = arith.constant 0 : i32
    return %c0_i32, %c0_i32_0 : i32, i32
  }
  func.func @transform_4(%arg0: i32, %arg1: i32) -> (i32, i32) {
    %c0_i32 = arith.constant 0 : i32
    %c0_i32_0 = arith.constant 0 : i32
    %c0_i32_1 = arith.constant 0 : i32
    return %c0_i32, %c0_i32_0 : i32, i32
  }
  func.func @transform_5(%arg0: i32, %arg1: i32) -> (i32, i32) {
    %c0_i32 = arith.constant 0 : i32
    %c0_i32_0 = arith.constant 0 : i32
    %c0_i32_1 = arith.constant 0 : i32
    return %c0_i32, %c0_i32_0 : i32, i32
  }
  func.func @transform_6(%arg0: i32, %arg1: i32) -> (i32, i32) {
    %c0_i32 = arith.constant 0 : i32
    %c0_i32_0 = arith.constant 0 : i32
    %c0_i32_1 = arith.constant 0 : i32
    return %c0_i32, %c0_i32_0 : i32, i32
  }
  func.func @transform_7(%arg0: i32, %arg1: i32) -> (i32, i32) {
    %c0_i32 = arith.constant 0 : i32
    %c0_i32_0 = arith.constant 0 : i32
    %c0_i32_1 = arith.constant 0 : i32
    return %c0_i32, %c0_i32_0 : i32, i32
  }
  func.func @transform_8(%arg0: i32, %arg1: i32) -> (i32, i32) {
    %c0_i32 = arith.constant 0 : i32
    %c0_i32_0 = arith.constant 0 : i32
    %c0_i32_1 = arith.constant 0 : i32
    return %c0_i32, %c0_i32_0 : i32, i32
  }
  func.func @transform_9(%arg0: i32, %arg1: i32) -> (i32, i32) {
    %c0_i32 = arith.constant 0 : i32
    %c0_i32_0 = arith.constant 0 : i32
    %c0_i32_1 = arith.constant 0 : i32
    return %c0_i32, %c0_i32_0 : i32, i32
  }
  func.func @transform_10(%arg0: i32, %arg1: i32) -> (i32, i32) {
    %c0_i32 = arith.constant 0 : i32
    %c0_i32_0 = arith.constant 0 : i32
    %c0_i32_1 = arith.constant 0 : i32
    return %c0_i32, %c0_i32_0 : i32, i32
  }
  func.func @transform_11(%arg0: i32, %arg1: i32) -> (i32, i32) {
    %c0_i32 = arith.constant 0 : i32
    %c0_i32_0 = arith.constant 0 : i32
    %c0_i32_1 = arith.constant 0 : i32
    return %c0_i32, %c0_i32_0 : i32, i32
  }
  func.func @transform_12(%arg0: i32, %arg1: i32) -> (i32, i32) {
    %c0_i32 = arith.constant 0 : i32
    %c0_i32_0 = arith.constant 0 : i32
    %c0_i32_1 = arith.constant 0 : i32
    return %c0_i32, %c0_i32_0 : i32, i32
  }
  func.func @transform_13(%arg0: i32, %arg1: i32) -> (i32, i32) {
    %c0_i32 = arith.constant 0 : i32
    %c0_i32_0 = arith.constant 0 : i32
    %c0_i32_1 = arith.constant 0 : i32
    return %c0_i32, %c0_i32_0 : i32, i32
  }
  func.func @transform_14(%arg0: i32, %arg1: i32) -> (i32, i32) {
    %c0_i32 = arith.constant 0 : i32
    %c0_i32_0 = arith.constant 0 : i32
    %c0_i32_1 = arith.constant 0 : i32
    return %c0_i32, %c0_i32_0 : i32, i32
  }
  func.func @transform_15(%arg0: i32, %arg1: i32) -> (i32, i32) {
    %c0_i32 = arith.constant 0 : i32
    %c0_i32_0 = arith.constant 0 : i32
    %c0_i32_1 = arith.constant 0 : i32
    return %c0_i32, %c0_i32_0 : i32, i32
  }
  func.func @transform_16(%arg0: i32, %arg1: i32) -> (i32, i32) {
    %c0_i32 = arith.constant 0 : i32
    %c0_i32_0 = arith.constant 0 : i32
    %c0_i32_1 = arith.constant 0 : i32
    return %c0_i32, %c0_i32_0 : i32, i32
  }
  func.func @transform_17(%arg0: i32, %arg1: i32) -> (i32, i32, i32) {
    %c0_i32 = arith.constant 0 : i32
    %c0_i32_0 = arith.constant 0 : i32
    return %arg0, %arg1, %c0_i32 : i32, i32, i32
  }
}

</mosaic_0001>

<bundles_post_ra>
// kernel: tpu_custom_call.1
= control target key start
LH: loop header
LB: loop body
LE: loop exit
PB: predicated region body
PF: predicated region fallthrough
CT: control target
= control target key end

     0   :  { %s5673_s0 = inlined_call_operand.hbm [shape: f32[2,16,64], index: 0, kind: input, shape index: {}]   ;;  %s5674_s1 = inlined_call_operand.hbm [shape: f32[1,64], index: 1, kind: input, shape index: {}]   ;;  %s5675_s2 = inlined_call_operand.hbm [shape: f32[1,64], index: 2, kind: input, shape index: {}]   ;;  %s5676_s3 = inlined_call_operand.hbm [shape: bf16[64,64], index: 3, kind: input, shape index: {}]   ;;  %s5677_s4 = inlined_call_operand.hbm [shape: f32[1,64], index: 4, kind: input, shape index: {}]   ;;  %s5678_s5 = inlined_call_operand.hbm [shape: bf16[64,128], index: 5, kind: input, shape index: {}]   ;;  %s5679_s6 = inlined_call_operand.hbm [shape: f32[1,128], index: 6, kind: input, shape index: {}]   ;;  %s5680_s7 = inlined_call_operand.hbm [shape: bf16[64,64], index: 7, kind: input, shape index: {}]   ;;  %s5681_s8 = inlined_call_operand.hbm [shape: f32[1,64], index: 8, kind: input, shape index: {}]   ;;  %s5682_s9 = inlined_call_operand.hbm [shape: f32[1,64], index: 9, kind: input, shape index: {}]   ;;  %s5683_s10 = inlined_call_operand.hbm [shape: f32[1,64], index: 10, kind: input, shape index: {}]   ;;  %s5684_s11 = inlined_call_operand.hbm [shape: f32[1,64], index: 11, kind: input, shape index: {}]   ;;  %s5685_s12 = inlined_call_operand.hbm [shape: bf16[64,256], index: 12, kind: input, shape index: {}]   ;;  %s5686_s13 = inlined_call_operand.hbm [shape: f32[1,256], index: 13, kind: input, shape index: {}]   ;;  %s5687_s14 = inlined_call_operand.hbm [shape: bf16[256,64], index: 14, kind: input, shape index: {}]   ;;  %s5688_s15 = inlined_call_operand.hbm [shape: f32[1,64], index: 15, kind: input, shape index: {}]   ;;  %s5689_s16 = inlined_call_operand.hbm [shape: f32[1,64], index: 16, kind: input, shape index: {}]   ;;  %s5690_s17 = inlined_call_operand.hbm [shape: f32[2,16,64], index: 17, kind: output, shape index: {}]  }
   0x1   :  { %5712 = sst [smem:[#allocation48_spill]] %s5673_s0 }
   0x2   :  { %5713 = sst [smem:[#allocation49_spill]] %s5674_s1 }
   0x3   :  { %5714 = sst [smem:[#allocation50_spill]] %s5675_s2 }
   0x4   :  { %5715 = sst [smem:[#allocation51_spill]] %s5676_s3 }
   0x5   :  { %5716 = sst [smem:[#allocation52_spill]] %s5677_s4 }
   0x6   :  { %5717 = sst [smem:[#allocation53_spill]] %s5690_s17 }
   0x7   :  { %22 = vsyncpa [#allocation3], 0 }
   0x8   :  { %24 = vsyncpa [#allocation3 + $0x1], 0 }
   0x9   :  { %25 = vsyncpa [#allocation6], 0 }
   0xa   :  { %26 = vsyncpa [#allocation9], 0 }
   0xb   :  { %27 = vsyncpa [#allocation12], 0 }
   0xc   :  { %28 = vsyncpa [#allocation15], 0 }
   0xd   :  { %29 = vsyncpa [#allocation18], 0 }
   0xe   :  { %30 = vsyncpa [#allocation21], 0 }
   0xf   :  { %31 = vsyncpa [#allocation24], 0 }
  0x10   :  { %32 = vsyncpa [#allocation27], 0 }
  0x11   :  { %33 = vsyncpa [#allocation4], 0 }
  0x12   :  { %35 = vsyncpa [#allocation4 + $0x1], 0  ;;  %s4720_s24 = smov 0   ;;  %s4722_s25 = smov 0  }
  0x13   :  { %s4724_s26 = smov 0   ;;  %s4726_s27 = smov 0  }
  0x14   :  { %s4728_s28 = smov 0   ;;  %s4730_s29 = smov 0  }
  0x15 LB: > { %5718 = sst [smem:[#allocation40_spill]] %s4572_s24  ;;  %s5693_s0 = sadd.s32 4294967295, %s4592_s29   ;;  %s4592_s29 = sphi %s4730_s29, %s41_s29   ;;  %s4588_s28 = sphi %s4728_s28, %s5767_s28   ;;  %s4584_s27 = sphi %s4726_s27, %s5765_s27   ;;  %s4580_s26 = sphi %s4724_s26, %s5766_s26   ;;  %s4576_s25 = sphi %s4722_s25, %s5764_s25   ;;  %s4572_s24 = sphi %s4720_s24, %s5763_s24  }
  0x16   : > { %5719 = sst [smem:[#allocation41_spill]] %s4576_s25  ;;  %p3396_p0 = scmp.ge.s32.totalorder %s4592_s29, 1 }
  0x17   : > { %5720 = sst [smem:[#allocation42_spill]] %s4580_s26  ;;  %p4754_p1 = scmp.eq.s32.totalorder %s5693_s0, 0 }
  0x18   : > { %5721 = sst [smem:[#allocation43_spill]] %s4584_s27  ;;  %p448_p2 = scmp.lt.s32.totalorder %s4592_s29, 3 }
  0x19   : > { %5722 = sst [smem:[#allocation44_spill]] %s4588_s28  ;;  %s4594_s19 = smov [#allocation5]  }
  0x1a   : > { %5723 = sst [smem:[#allocation45_spill]] %s4592_s29  ;;  %p4759_p3 = pnand %p3396_p0, %p448_p2 }
  0x1b   : > { %s5724_s30 = scalar_select %p4754_p1, 1, 0 }
  0x1c   : > { %s5726_s18 = scalar_select %p4759_p3, 1, 0 }
  0x1d   : > { %5725 = sst [smem:[#allocation46_spill]] %s5724_s30  ;;  %s461_s1 = sshll.u32 %s4594_s19, 4  ;;  %s462_s1 = int_to_ptr.vmem [resolvable:$true] %s461_s1 }
  0x1e   : > { %5727 = sst [smem:[#allocation47_spill]] %s5726_s18  ;;  %p3722_p5 = pneg %p4759_p3 }
  0x1f   : > { %s4595_s20 = smov [#allocation8]   ;;  %s4596_s23 = smov [#allocation11]  }
  0x20   : > { %s482_s21 = sshll.u32 %s4595_s20, 4  ;;  %p4768_p6 = pnand %p3722_p5, %p4754_p1  ;;  %s4772_s21 = int_to_ptr.vmem [resolvable:$true] %s482_s21 }
  0x21   : > { %s4774_s0 = sshll.u32 %s4596_s23, 4  ;;  %s5729_s19 = sld [smem:[#allocation49_spill]]  ;;  %s507_s0 = int_to_ptr.vmem [resolvable:$true] %s4774_s0 }
  0x22   : > { %p4784_p8 = pneg %p4768_p6 }
  0x27   : > { %s4000_s24 = scalar_lea.hbm %s5729_s19, 16 }
  0x28   : > { %p4001_p7 = scmp.ne.s32.totalorder %s5729_s19, %s4000_s24  ;;  %p4007_p11 = scmp.lt.u32.totalorder %s4000_s24, %s5729_s19 }
  0x2a   : > { %p4003_p9 = pnand %p4784_p8, %p4001_p7 }
  0x2c   : > { %p4004_p10 = pneg %p4003_p9 }
  0x2e   : > { %p4009_p12 = pnand %p4007_p11, %p4004_p10 }
  0x30   : > { %4012 = shalt.err (!%p4009_p12)
}
  0x31   : > { %s4013_s17 = scalar_lea.vmem %s462_s1, 16  ;;  %s4020_s25 = scalar_lea.vmem %s462_s1, 32 }
  0x32   : > { %p4014_p13 = scmp.ne.s32.totalorder %s462_s1, %s4013_s17  ;;  %p4021_p5 = scmp.lt.s32.totalorder %s462_s1, %s462_s1 }
  0x33   : > { %p4022_p4 = scmp.lt.s32.totalorder %s4020_s25, %s4013_s17 }
  0x34   : > { %p4016_p0 = pnand %p4014_p13, %p4784_p8 }
  0x35   : > { %p4023_p3 = por %p4022_p4, %p4021_p5 }
  0x36   : > { %p4017_p2 = pneg %p4016_p0 }
  0x38   : > { %p4024_p1 = pnand %p4023_p3, %p4017_p2 }
  0x3a   : > { %4027 = shalt.err (!%p4024_p1)
}
  0x3b   : > { %3725 = dma.hbm_to_vmem [thread:$0]  (!%p4768_p6), %s5729_s19, 16, %s462_s1, [#allocation6]  }
  0x3c   : > { %s5731_s3 = sld [smem:[#allocation51_spill]] }
  0x42   : > { %s4028_s23 = scalar_lea.hbm %s5731_s3, 512 }
  0x43   : > { %p4029_p7 = scmp.ne.s32.totalorder %s5731_s3, %s4028_s23  ;;  %p4035_p1 = scmp.lt.u32.totalorder %s4028_s23, %s5731_s3 }
  0x45   : > { %p4031_p9 = pnand %p4029_p7, %p4784_p8 }
  0x47   : > { %p4032_p4 = pneg %p4031_p9 }
  0x49   : > { %p4037_p3 = pnand %p4035_p1, %p4032_p4 }
  0x4b   : > { %4040 = shalt.err (!%p4037_p3)
}
  0x4c   : > { %s4041_s1 = scalar_lea.vmem %s4772_s21, 512  ;;  %p4049_p13 = scmp.lt.s32.totalorder %s4772_s21, %s4772_s21 }
  0x4d   : > { %p4042_p10 = scmp.ne.s32.totalorder %s4772_s21, %s4041_s1  ;;  %p4050_p0 = scmp.lt.s32.totalorder %s4041_s1, %s4041_s1 }
  0x4f   : > { %p4044_p11 = pnand %p4042_p10, %p4784_p8  ;;  %p4051_p2 = por %p4050_p0, %p4049_p13 }
  0x51   : > { %p4045_p12 = pneg %p4044_p11 }
  0x53   : > { %p4052_p5 = pnand %p4051_p2, %p4045_p12 }
  0x55   : > { %4055 = shalt.err (!%p4052_p5)
}
  0x56   : > { %s5708_s26 = smov 64   ;;  %s4598_s28 = smov 4  }
  0x57   : > { %3731 = dma.hbm_to_vmem [thread:$0]  (!%p4768_p6), %s5731_s3, 512, %s4772_s21, [#allocation9], %s5708_s26, %s5708_s26, %s4598_s28  }
  0x58   : > { %s4056_s23 = scalar_lea.hbm %s5678_s5, 512 }
  0x59   : > { %p4057_p7 = scmp.ne.s32.totalorder %s5678_s5, %s4056_s23  ;;  %p4063_p1 = scmp.lt.u32.totalorder %s4056_s23, %s5678_s5 }
  0x5b   : > { %p4059_p9 = pnand %p4057_p7, %p4784_p8 }
  0x5d   : > { %p4060_p4 = pneg %p4059_p9 }
  0x5f   : > { %p4065_p3 = pnand %p4063_p1, %p4060_p4 }
  0x61   : > { %4068 = shalt.err (!%p4065_p3)
}
  0x62   : > { %s4069_s27 = scalar_lea.vmem %s507_s0, 512  ;;  %p4077_p13 = scmp.lt.s32.totalorder %s507_s0, %s507_s0 }
  0x63   : > { %p4070_p10 = scmp.ne.s32.totalorder %s507_s0, %s4069_s27  ;;  %p4078_p0 = scmp.lt.s32.totalorder %s4069_s27, %s4069_s27 }
  0x65   : > { %p4072_p11 = pnand %p4070_p10, %p4784_p8  ;;  %p4079_p2 = por %p4078_p0, %p4077_p13 }
  0x67   : > { %p4073_p12 = pneg %p4072_p11 }
  0x69   : > { %p4080_p5 = pnand %p4079_p2, %p4073_p12 }
  0x6b   : > { %4083 = shalt.err (!%p4080_p5)
}
  0x6c   : > { %3737 = dma.hbm_to_vmem [thread:$0]  (!%p4768_p6), %s5678_s5, 512, %s507_s0, [#allocation12], %s5708_s26, %s5708_s26, %s4598_s28  }
  0x6d   : > { %s4599_s18 = smov [#allocation14]   ;;  %s4600_s30 = smov [#allocation17]  }
  0x6e   : > { %s530_s24 = sshll.u32 %s4599_s18, 4  ;;  %s555_s23 = sshll.u32 %s4600_s30, 4  ;;  %s531_s24 = int_to_ptr.vmem [resolvable:$true] %s530_s24  ;;  %s556_s23 = int_to_ptr.vmem [resolvable:$true] %s555_s23 }
  0x6f   : > { %s4084_s1 = scalar_lea.hbm %s5680_s7, 512 }
  0x70   : > { %p4085_p7 = scmp.ne.s32.totalorder %s5680_s7, %s4084_s1  ;;  %p4091_p1 = scmp.lt.u32.totalorder %s4084_s1, %s5680_s7 }
  0x72   : > { %p4087_p9 = pnand %p4085_p7, %p4784_p8 }
  0x74   : > { %p4088_p4 = pneg %p4087_p9 }
  0x76   : > { %p4093_p3 = pnand %p4091_p1, %p4088_p4 }
  0x78   : > { %4096 = shalt.err (!%p4093_p3)
}
  0x79   : > { %s4097_s0 = scalar_lea.vmem %s531_s24, 512  ;;  %p4105_p13 = scmp.lt.s32.totalorder %s531_s24, %s531_s24 }
  0x7a   : > { %p4098_p10 = scmp.ne.s32.totalorder %s531_s24, %s4097_s0  ;;  %p4106_p0 = scmp.lt.s32.totalorder %s4097_s0, %s4097_s0 }
  0x7c   : > { %p4100_p11 = pnand %p4098_p10, %p4784_p8  ;;  %p4107_p2 = por %p4106_p0, %p4105_p13 }
  0x7e   : > { %p4101_p12 = pneg %p4100_p11 }
  0x80   : > { %p4108_p5 = pnand %p4107_p2, %p4101_p12 }
  0x82   : > { %4111 = shalt.err (!%p4108_p5)
}
  0x83   : > { %3743 = dma.hbm_to_vmem [thread:$0]  (!%p4768_p6), %s5680_s7, 512, %s531_s24, [#allocation15], %s5708_s26, %s5708_s26, %s4598_s28  }
  0x84   : > { %s4112_s30 = scalar_lea.hbm %s5682_s9, 16 }
  0x85   : > { %p4113_p7 = scmp.ne.s32.totalorder %s5682_s9, %s4112_s30  ;;  %p4119_p1 = scmp.lt.u32.totalorder %s4112_s30, %s5682_s9 }
  0x87   : > { %p4115_p9 = pnand %p4113_p7, %p4784_p8 }
  0x89   : > { %p4116_p4 = pneg %p4115_p9 }
  0x8b   : > { %p4121_p3 = pnand %p4119_p1, %p4116_p4 }
  0x8d   : > { %4124 = shalt.err (!%p4121_p3)
}
  0x8e   : > { %s4125_s21 = scalar_lea.vmem %s556_s23, 16  ;;  %s4132_s24 = scalar_lea.vmem %s556_s23, 32 }
  0x8f   : > { %p4126_p10 = scmp.ne.s32.totalorder %s556_s23, %s4125_s21  ;;  %p4133_p13 = scmp.lt.s32.totalorder %s556_s23, %s556_s23 }
  0x90   : > { %p4134_p0 = scmp.lt.s32.totalorder %s4132_s24, %s4125_s21 }
  0x91   : > { %p4128_p11 = pnand %p4126_p10, %p4784_p8 }
  0x92   : > { %p4135_p2 = por %p4134_p0, %p4133_p13 }
  0x93   : > { %p4129_p12 = pneg %p4128_p11 }
  0x95   : > { %p4136_p5 = pnand %p4135_p2, %p4129_p12 }
  0x97   : > { %4139 = shalt.err (!%p4136_p5)
}
  0x98   : > { %3749 = dma.hbm_to_vmem [thread:$0]  (!%p4768_p6), %s5682_s9, 16, %s556_s23, [#allocation18]  }
  0x99   : > { %s4601_s29 = smov [#allocation20]   ;;  %s4602_s18 = smov [#allocation23]  }
  0x9a   : > { %s577_s19 = sshll.u32 %s4601_s29, 4  ;;  %s601_s30 = sshll.u32 %s4602_s18, 4  ;;  %s578_s19 = int_to_ptr.vmem [resolvable:$true] %s577_s19  ;;  %s602_s30 = int_to_ptr.vmem [resolvable:$true] %s601_s30 }
  0x9b   : > { %s4140_s1 = scalar_lea.hbm %s5684_s11, 16 }
  0x9c   : > { %p4141_p7 = scmp.ne.s32.totalorder %s5684_s11, %s4140_s1  ;;  %p4147_p1 = scmp.lt.u32.totalorder %s4140_s1, %s5684_s11 }
  0x9e   : > { %p4143_p9 = pnand %p4141_p7, %p4784_p8 }
  0xa0   : > { %p4144_p4 = pneg %p4143_p9 }
  0xa2   : > { %p4149_p3 = pnand %p4147_p1, %p4144_p4 }
  0xa4   : > { %4152 = shalt.err (!%p4149_p3)
}
  0xa5   : > { %s4153_s23 = scalar_lea.vmem %s578_s19, 16  ;;  %s4160_s3 = scalar_lea.vmem %s578_s19, 32 }
  0xa6   : > { %p4154_p10 = scmp.ne.s32.totalorder %s578_s19, %s4153_s23  ;;  %p4161_p13 = scmp.lt.s32.totalorder %s578_s19, %s578_s19 }
  0xa7   : > { %p4162_p0 = scmp.lt.s32.totalorder %s4160_s3, %s4153_s23 }
  0xa8   : > { %p4156_p11 = pnand %p4154_p10, %p4784_p8 }
  0xa9   : > { %p4163_p2 = por %p4162_p0, %p4161_p13 }
  0xaa   : > { %p4157_p12 = pneg %p4156_p11 }
  0xac   : > { %p4164_p5 = pnand %p4163_p2, %p4157_p12 }
  0xae   : > { %4167 = shalt.err (!%p4164_p5)
}
  0xaf   : > { %3755 = dma.hbm_to_vmem [thread:$0]  (!%p4768_p6), %s5684_s11, 16, %s578_s19, [#allocation21]  }
  0xb0   : > { %s4168_s1 = scalar_lea.hbm %s5686_s13, 32 }
  0xb1   : > { %p4169_p7 = scmp.ne.s32.totalorder %s5686_s13, %s4168_s1  ;;  %p4175_p1 = scmp.lt.u32.totalorder %s4168_s1, %s5686_s13 }
  0xb3   : > { %p4171_p9 = pnand %p4169_p7, %p4784_p8 }
  0xb5   : > { %p4172_p4 = pneg %p4171_p9 }
  0xb7   : > { %p4177_p3 = pnand %p4175_p1, %p4172_p4 }
  0xb9   : > { %4180 = shalt.err (!%p4177_p3)
}
  0xba   : > { %s4181_s23 = scalar_lea.vmem %s602_s30, 32  ;;  %p4189_p13 = scmp.lt.s32.totalorder %s602_s30, %s602_s30 }
  0xbb   : > { %p4182_p10 = scmp.ne.s32.totalorder %s602_s30, %s4181_s23  ;;  %p4190_p0 = scmp.lt.s32.totalorder %s4181_s23, %s4181_s23 }
  0xbd   : > { %p4184_p11 = pnand %p4182_p10, %p4784_p8  ;;  %p4191_p2 = por %p4190_p0, %p4189_p13 }
  0xbf   : > { %p4185_p12 = pneg %p4184_p11 }
  0xc1   : > { %p4192_p5 = pnand %p4191_p2, %p4185_p12 }
  0xc3   : > { %4195 = shalt.err (!%p4192_p5)
}
  0xc4   : > { %3761 = dma.hbm_to_vmem [thread:$0]  (!%p4768_p6), %s5686_s13, 32, %s602_s30, [#allocation24]  }
  0xc5   : > { %s4603_s29 = smov [#allocation26]   ;;  %s4604_s17 = smov [#allocation7]  }
  0xc6   : > { %s625_s18 = sshll.u32 %s4603_s29, 4  ;;  %s472_s25 = sshll.u32 %s4604_s17, 4  ;;  %s626_s18 = int_to_ptr.vmem [resolvable:$true] %s625_s18  ;;  %s473_s25 = int_to_ptr.vmem [resolvable:$true] %s472_s25 }
  0xc7   : > { %s4196_s21 = scalar_lea.hbm %s5688_s15, 16 }
  0xc8   : > { %p4197_p7 = scmp.ne.s32.totalorder %s5688_s15, %s4196_s21  ;;  %p4203_p1 = scmp.lt.u32.totalorder %s4196_s21, %s5688_s15 }
  0xca   : > { %p4199_p9 = pnand %p4197_p7, %p4784_p8 }
  0xcc   : > { %p4200_p4 = pneg %p4199_p9 }
  0xce   : > { %p4205_p3 = pnand %p4203_p1, %p4200_p4 }
  0xd0   : > { %4208 = shalt.err (!%p4205_p3)
}
  0xd1   : > { %s4209_s30 = scalar_lea.vmem %s626_s18, 16  ;;  %s4216_s3 = scalar_lea.vmem %s626_s18, 32 }
  0xd2   : > { %p4210_p10 = scmp.ne.s32.totalorder %s626_s18, %s4209_s30  ;;  %p4217_p13 = scmp.lt.s32.totalorder %s626_s18, %s626_s18 }
  0xd3   : > { %p4218_p0 = scmp.lt.s32.totalorder %s4216_s3, %s4209_s30 }
  0xd4   : > { %p4212_p11 = pnand %p4210_p10, %p4784_p8 }
  0xd5   : > { %p4219_p2 = por %p4218_p0, %p4217_p13 }
  0xd6   : > { %p4213_p12 = pneg %p4212_p11 }
  0xd8   : > { %p4220_p5 = pnand %p4219_p2, %p4213_p12 }
  0xda   : > { %4223 = shalt.err (!%p4220_p5)
}
  0xdb   : > { %3767 = dma.hbm_to_vmem [thread:$0]  (!%p4768_p6), %s5688_s15, 16, %s626_s18, [#allocation27]  }
  0xdc   : > { %s5732_s2 = sld [smem:[#allocation50_spill]] }
  0xe2   : > { %s4224_s21 = scalar_lea.hbm %s5732_s2, 16 }
  0xe3   : > { %p4225_p7 = scmp.ne.s32.totalorder %s5732_s2, %s4224_s21  ;;  %p4231_p1 = scmp.lt.u32.totalorder %s4224_s21, %s5732_s2 }
  0xe5   : > { %p4227_p9 = pnand %p4225_p7, %p4784_p8 }
  0xe7   : > { %p4228_p4 = pneg %p4227_p9 }
  0xe9   : > { %p4233_p3 = pnand %p4231_p1, %p4228_p4 }
  0xeb   : > { %4236 = shalt.err (!%p4233_p3)
}
  0xec   : > { %s4237_s30 = scalar_lea.vmem %s473_s25, 16  ;;  %s4244_s18 = scalar_lea.vmem %s473_s25, 32 }
  0xed   : > { %p4238_p10 = scmp.ne.s32.totalorder %s473_s25, %s4237_s30  ;;  %p4245_p13 = scmp.lt.s32.totalorder %s473_s25, %s473_s25 }
  0xee   : > { %p4246_p0 = scmp.lt.s32.totalorder %s4244_s18, %s4237_s30 }
  0xef   : > { %p4240_p11 = pnand %p4238_p10, %p4784_p8 }
  0xf0   : > { %p4247_p2 = por %p4246_p0, %p4245_p13 }
  0xf1   : > { %p4241_p12 = pneg %p4240_p11 }
  0xf3   : > { %p4248_p5 = pnand %p4247_p2, %p4241_p12 }
  0xf5   : > { %4251 = shalt.err (!%p4248_p5)
}
  0xf6   : > { %3728 = dma.hbm_to_vmem [thread:$0]  (!%p4768_p6), %s5732_s2, 16, %s473_s25, [#allocation6]  }
  0xf7   : > { %s4605_s17 = smov [#allocation10]   ;;  %s4606_s27 = smov [#allocation13]  }
  0xf8   : > { %s496_s1 = sshll.u32 %s4605_s17, 4  ;;  %s520_s21 = sshll.u32 %s4606_s27, 4  ;;  %s497_s1 = int_to_ptr.vmem [resolvable:$true] %s496_s1  ;;  %s521_s21 = int_to_ptr.vmem [resolvable:$true] %s520_s21 }
  0xf9   : > { %s5733_s4 = sld [smem:[#allocation52_spill]] }
  0xff   : > { %s4252_s23 = scalar_lea.hbm %s5733_s4, 16 }
 0x100   : > { %p4253_p7 = scmp.ne.s32.totalorder %s5733_s4, %s4252_s23  ;;  %p4259_p1 = scmp.lt.u32.totalorder %s4252_s23, %s5733_s4 }
 0x102   : > { %p4255_p9 = pnand %p4253_p7, %p4784_p8 }
 0x104   : > { %p4256_p4 = pneg %p4255_p9 }
 0x106   : > { %p4261_p3 = pnand %p4259_p1, %p4256_p4 }
 0x108   : > { %4264 = shalt.err (!%p4261_p3)
}
 0x109   : > { %s4265_s25 = scalar_lea.vmem %s497_s1, 16  ;;  %s4272_s29 = scalar_lea.vmem %s497_s1, 32 }
 0x10a   : > { %p4266_p10 = scmp.ne.s32.totalorder %s497_s1, %s4265_s25  ;;  %p4273_p13 = scmp.lt.s32.totalorder %s497_s1, %s497_s1 }
 0x10b   : > { %p4274_p0 = scmp.lt.s32.totalorder %s4272_s29, %s4265_s25 }
 0x10c   : > { %p4268_p11 = pnand %p4266_p10, %p4784_p8 }
 0x10d   : > { %p4275_p2 = por %p4274_p0, %p4273_p13 }
 0x10e   : > { %p4269_p12 = pneg %p4268_p11 }
 0x110   : > { %p4276_p5 = pnand %p4275_p2, %p4269_p12 }
 0x112   : > { %4279 = shalt.err (!%p4276_p5)
}
 0x113   : > { %3734 = dma.hbm_to_vmem [thread:$0]  (!%p4768_p6), %s5733_s4, 16, %s497_s1, [#allocation9]  }
 0x114   : > { %s4280_s23 = scalar_lea.hbm %s5679_s6, 16 }
 0x115   : > { %p4281_p7 = scmp.ne.s32.totalorder %s5679_s6, %s4280_s23  ;;  %p4287_p1 = scmp.lt.u32.totalorder %s4280_s23, %s5679_s6 }
 0x117   : > { %p4283_p9 = pnand %p4281_p7, %p4784_p8 }
 0x119   : > { %p4284_p4 = pneg %p4283_p9 }
 0x11b   : > { %p4289_p3 = pnand %p4287_p1, %p4284_p4 }
 0x11d   : > { %4292 = shalt.err (!%p4289_p3)
}
 0x11e   : > { %s4293_s25 = scalar_lea.vmem %s521_s21, 16  ;;  %s4300_s1 = scalar_lea.vmem %s521_s21, 32 }
 0x11f   : > { %p4294_p10 = scmp.ne.s32.totalorder %s521_s21, %s4293_s25  ;;  %p4301_p13 = scmp.lt.s32.totalorder %s521_s21, %s521_s21 }
 0x120   : > { %p4302_p0 = scmp.lt.s32.totalorder %s4300_s1, %s4293_s25 }
 0x121   : > { %p4296_p11 = pnand %p4294_p10, %p4784_p8 }
 0x122   : > { %p4303_p2 = por %p4302_p0, %p4301_p13 }
 0x123   : > { %p4297_p12 = pneg %p4296_p11 }
 0x125   : > { %p4304_p5 = pnand %p4303_p2, %p4297_p12 }
 0x127   : > { %4307 = shalt.err (!%p4304_p5)
}
 0x128   : > { %3740 = dma.hbm_to_vmem [thread:$0]  (!%p4768_p6), %s5679_s6, 16, %s521_s21, [#allocation12]  }
 0x129   : > { %s4607_s27 = smov [#allocation16]   ;;  %s4608_s0 = smov [#allocation19]  }
 0x12a   : > { %s544_s24 = sshll.u32 %s4607_s27, 4  ;;  %s566_s23 = sshll.u32 %s4608_s0, 4  ;;  %s545_s24 = int_to_ptr.vmem [resolvable:$true] %s544_s24  ;;  %s567_s23 = int_to_ptr.vmem [resolvable:$true] %s566_s23 }
 0x12b   : > { %s4308_s18 = scalar_lea.hbm %s5681_s8, 16 }
 0x12c   : > { %p4309_p7 = scmp.ne.s32.totalorder %s5681_s8, %s4308_s18  ;;  %p4315_p1 = scmp.lt.u32.totalorder %s4308_s18, %s5681_s8 }
 0x12e   : > { %p4311_p9 = pnand %p4309_p7, %p4784_p8 }
 0x130   : > { %p4312_p4 = pneg %p4311_p9 }
 0x132   : > { %p4317_p3 = pnand %p4315_p1, %p4312_p4 }
 0x134   : > { %4320 = shalt.err (!%p4317_p3)
}
 0x135   : > { %s4321_s21 = scalar_lea.vmem %s545_s24, 16  ;;  %s4328_s17 = scalar_lea.vmem %s545_s24, 32 }
 0x136   : > { %p4322_p10 = scmp.ne.s32.totalorder %s545_s24, %s4321_s21  ;;  %p4329_p13 = scmp.lt.s32.totalorder %s545_s24, %s545_s24 }
 0x137   : > { %p4330_p0 = scmp.lt.s32.totalorder %s4328_s17, %s4321_s21 }
 0x138   : > { %p4324_p11 = pnand %p4322_p10, %p4784_p8 }
 0x139   : > { %p4331_p2 = por %p4330_p0, %p4329_p13 }
 0x13a   : > { %p4325_p12 = pneg %p4324_p11 }
 0x13c   : > { %p4332_p5 = pnand %p4331_p2, %p4325_p12 }
 0x13e   : > { %4335 = shalt.err (!%p4332_p5)
}
 0x13f   : > { %3746 = dma.hbm_to_vmem [thread:$0]  (!%p4768_p6), %s5681_s8, 16, %s545_s24, [#allocation15]  }
 0x140   : > { %s4336_s18 = scalar_lea.hbm %s5683_s10, 16 }
 0x141   : > { %p4337_p7 = scmp.ne.s32.totalorder %s5683_s10, %s4336_s18  ;;  %p4343_p1 = scmp.lt.u32.totalorder %s4336_s18, %s5683_s10 }
 0x143   : > { %p4339_p9 = pnand %p4337_p7, %p4784_p8 }
 0x145   : > { %p4340_p4 = pneg %p4339_p9 }
 0x147   : > { %p4345_p3 = pnand %p4343_p1, %p4340_p4 }
 0x149   : > { %4348 = shalt.err (!%p4345_p3)
}
 0x14a   : > { %s4349_s21 = scalar_lea.vmem %s567_s23, 16  ;;  %s4356_s24 = scalar_lea.vmem %s567_s23, 32 }
 0x14b   : > { %p4350_p10 = scmp.ne.s32.totalorder %s567_s23, %s4349_s21  ;;  %p4357_p13 = scmp.lt.s32.totalorder %s567_s23, %s567_s23 }
 0x14c   : > { %p4358_p0 = scmp.lt.s32.totalorder %s4356_s24, %s4349_s21 }
 0x14d   : > { %p4352_p11 = pnand %p4350_p10, %p4784_p8 }
 0x14e   : > { %p4359_p2 = por %p4358_p0, %p4357_p13 }
 0x14f   : > { %p4353_p12 = pneg %p4352_p11 }
 0x151   : > { %p4360_p5 = pnand %p4359_p2, %p4353_p12 }
 0x153   : > { %4363 = shalt.err (!%p4360_p5)
}
 0x154   : > { %3752 = dma.hbm_to_vmem [thread:$0]  (!%p4768_p6), %s5683_s10, 16, %s567_s23, [#allocation18]  }
 0x155   : > { %s4609_s0 = smov [#allocation22]   ;;  %s4364_s3 = scalar_lea.hbm %s5685_s12, 1024 }
 0x156   : > { %s587_s19 = sshll.u32 %s4609_s0, 4  ;;  %p4365_p7 = scmp.ne.s32.totalorder %s5685_s12, %s4364_s3  ;;  %s588_s19 = int_to_ptr.vmem [resolvable:$true] %s587_s19 }
 0x157   : > { %p4371_p1 = scmp.lt.u32.totalorder %s4364_s3, %s5685_s12 }
 0x158   : > { %p4367_p9 = pnand %p4365_p7, %p4784_p8 }
 0x15a   : > { %p4368_p4 = pneg %p4367_p9 }
 0x15c   : > { %p4373_p3 = pnand %p4371_p1, %p4368_p4 }
 0x15e   : > { %4376 = shalt.err (!%p4373_p3)
}
 0x15f   : > { %s4377_s23 = scalar_lea.vmem %s588_s19, 1024  ;;  %p4385_p13 = scmp.lt.s32.totalorder %s588_s19, %s588_s19 }
 0x160   : > { %p4378_p10 = scmp.ne.s32.totalorder %s588_s19, %s4377_s23  ;;  %p4386_p0 = scmp.lt.s32.totalorder %s4377_s23, %s4377_s23 }
 0x162   : > { %p4380_p11 = pnand %p4378_p10, %p4784_p8  ;;  %p4387_p2 = por %p4386_p0, %p4385_p13 }
 0x164   : > { %p4381_p12 = pneg %p4380_p11 }
 0x166   : > { %p4388_p5 = pnand %p4387_p2, %p4381_p12 }
 0x168   : > { %4391 = shalt.err (!%p4388_p5)
}
 0x169   : > { %s5709_s24 = smov 128   ;;  %s5710_s17 = smov 8  }
 0x16a   : > { %3758 = dma.hbm_to_vmem [thread:$0]  (!%p4768_p6), %s5685_s12, 1024, %s588_s19, [#allocation21], %s5709_s24, %s5709_s24, %s5710_s17  }
 0x16b   : > { %s4612_s30 = smov [#allocation25]   ;;  %s4613_s3 = smov [#allocation28]  }
 0x16c   : > { %s611_s18 = sshll.u32 %s4612_s30, 4  ;;  %s636_s25 = sshll.u32 %s4613_s3, 4  ;;  %s612_s18 = int_to_ptr.vmem [resolvable:$true] %s611_s18  ;;  %s5052_s25 = int_to_ptr.vmem [resolvable:$true] %s636_s25 }
 0x16d   : > { %s4392_s21 = scalar_lea.hbm %s5687_s14, 2048 }
 0x16e   : > { %p4393_p7 = scmp.ne.s32.totalorder %s5687_s14, %s4392_s21  ;;  %p4399_p1 = scmp.lt.u32.totalorder %s4392_s21, %s5687_s14 }
 0x170   : > { %p4395_p9 = pnand %p4393_p7, %p4784_p8 }
 0x172   : > { %p4396_p4 = pneg %p4395_p9 }
 0x174   : > { %p4401_p3 = pnand %p4399_p1, %p4396_p4 }
 0x176   : > { %4404 = shalt.err (!%p4401_p3)
}
 0x177   : > { %s4405_s0 = scalar_lea.vmem %s612_s18, 2048  ;;  %p4413_p13 = scmp.lt.s32.totalorder %s612_s18, %s612_s18 }
 0x178   : > { %p4406_p10 = scmp.ne.s32.totalorder %s612_s18, %s4405_s0  ;;  %p4414_p0 = scmp.lt.s32.totalorder %s4405_s0, %s4405_s0 }
 0x17a   : > { %p4408_p11 = pnand %p4406_p10, %p4784_p8  ;;  %p4415_p2 = por %p4414_p0, %p4413_p13 }
 0x17c   : > { %p4409_p12 = pneg %p4408_p11 }
 0x17e   : > { %p4416_p5 = pnand %p4415_p2, %p4409_p12 }
 0x180   : > { %4419 = shalt.err (!%p4416_p5)
}
 0x181   : > { %s5734_s26 = smov 64   ;;  %s4420_s21 = scalar_lea.hbm %s5689_s16, 16 }
 0x182   : > { %3764 = dma.hbm_to_vmem [thread:$0]  (!%p4768_p6), %s5687_s14, 2048, %s612_s18, [#allocation24], %s5734_s26, %s5734_s26, %s4598_s28  }
 0x183   : > { %p4421_p7 = scmp.ne.s32.totalorder %s5689_s16, %s4420_s21  ;;  %p4427_p1 = scmp.lt.u32.totalorder %s4420_s21, %s5689_s16 }
 0x185   : > { %p4423_p9 = pnand %p4421_p7, %p4784_p8 }
 0x187   : > { %p4424_p4 = pneg %p4423_p9 }
 0x189   : > { %p4429_p3 = pnand %p4427_p1, %p4424_p4 }
 0x18b   : > { %4432 = shalt.err (!%p4429_p3)
}
 0x18c   : > { %s4433_s28 = scalar_lea.vmem %s5052_s25, 16  ;;  %s4440_s18 = scalar_lea.vmem %s5052_s25, 32 }
 0x18d   : > { %p4434_p10 = scmp.ne.s32.totalorder %s5052_s25, %s4433_s28  ;;  %p4441_p13 = scmp.lt.s32.totalorder %s5052_s25, %s5052_s25 }
 0x18e   : > { %p4442_p0 = scmp.lt.s32.totalorder %s4440_s18, %s4433_s28 }
 0x18f   : > { %p4436_p11 = pnand %p4434_p10, %p4784_p8 }
 0x190   : > { %p4443_p2 = por %p4442_p0, %p4441_p13 }
 0x191   : > { %p4437_p12 = pneg %p4436_p11 }
 0x193   : > { %p4444_p5 = pnand %p4443_p2, %p4437_p12 }
 0x195   : > { %4447 = shalt.err (!%p4444_p5)
}
 0x196   : > { %s5735_s3 = sld [smem:[#allocation45_spill]]  ;;  %s5736_s1 = sld [smem:[#allocation44_spill]] }
 0x197   : > { %s5737_s29 = sld [smem:[#allocation42_spill]]  ;;  %s5738_s21 = sld [smem:[#allocation41_spill]] }
 0x198   : > { %s5739_s20 = sld [smem:[#allocation40_spill]]  ;;  %s5740_s23 = sld [smem:[#allocation46_spill]] }
 0x199   : > { %3770 = dma.hbm_to_vmem [thread:$0]  (!%p4768_p6), %s5689_s16, 16, %s5052_s25, [#allocation27]  }
 0x19a   : > { %s5747_s17 = sld [smem:[#allocation48_spill]] }
 0x19c   : > { %s3395_s27 = sadd.s32 4294967294, %s5735_s3   ;;  %s53_s19 = sadd.s32 1, %s5736_s1 }
 0x19d   : > { %p55_p8 = scmp.ge.s32.totalorder %s53_s19, 2  ;;  %s60_s22 = sadd.s32 1, %s5737_s29 }
 0x19e   : > { %p67_p7 = scmp.ne.s32.totalorder %s5737_s29, %s5738_s21  ;;  %p68_p9 = scmp.eq.s32.totalorder %s5735_s3, 0 }
 0x19f   : > { %s5769_s19 = smov (%p55_p8, %s53_s19), 0  ;;  %p73_p1 = scmp.ne.s32.totalorder %s5738_s21, %s5739_s20 }
 0x1a0   : > { %p5107_p4 = por %p68_p9, %p67_p7  ;;  %s57_s25 = ssub.s32 %s5736_s1, %s5769_s19 }
 0x1a1   : > { %s5742_s28 = sadd.s32 4294967295, %s5735_s3   ;;  %p58_p3 = scmp.eq.s32.totalorder %s57_s25, 0 }
 0x1a2   : > { %p435_p6 = scmp.eq.s32.totalorder %s5742_s28, 1  ;;  %p5743_p10 = scmp.ne.s32.totalorder %s5740_s23, 0 }
 0x1a3   : > { %p441_p13 = scmp.eq.s32.totalorder %s3395_s27, 1  ;;  %p3795_p2 = scmp.lt.s32.totalorder %s5735_s3, 2 }
 0x1a4   : > { %p5119_p11 = por %p5743_p10, %p73_p1  ;;  %p5123_p12 = por %p435_p6, %p67_p7 }
 0x1a5   : > { %s5128_s30 = scalar_select %p58_p3, %s5737_s29, %s60_s22  }
 0x1a6   : > { %s5745_s26 = scalar_select %p5123_p12, 1, 0 }
 0x1a7   : > { %p5130_p0 = por %p441_p13, %p73_p1  ;;  %s647_s21 = sand.u32 1, %s5737_s29  }
 0x1a8   : > { %s3515_s20 = sshll.u32 %s5736_s1, 8  ;;  %s3414_s25 = sshll.u32 %s647_s21, 4 }
 0x1a9   : > { %s5746_s24 = scalar_select %p5130_p0, 1, 0 }
 0x1aa   : > { %s5140_s2 = scalar_lea.hbm %s5747_s17, %s3515_s20  ;;  %s651_s27 = scalar_lea.vmem [#allocation2], %s3414_s25 }
 0x1ab   : > { %s658_s22 = sshll.u32 %s651_s27, 4  ;;  %p5144_p5 = pnand %p3795_p2, %p5107_p4  ;;  %s5148_s22 = int_to_ptr.vmem [resolvable:$true] %s658_s22 }
 0x1ac   : > { %s5150_s3 = scalar_lea.sflag [#allocation3], %s647_s21  ;;  %s4448_s1 = scalar_lea.hbm %s5140_s2, 256 }
 0x1ad   : > { %p4449_p8 = scmp.ne.s32.totalorder %s5140_s2, %s4448_s1  ;;  %p4450_p7 = pneg %p5144_p5 }
 0x1ae   : > { %s4453_s20 = scalar_lea.hbm %s5747_s17, 512  ;;  %p4454_p4 = scmp.lt.u32.totalorder %s5140_s2, %s5747_s17 }
 0x1af   : > { %p4451_p9 = pnand %p4450_p7, %p4449_p8  ;;  %p4455_p6 = scmp.lt.u32.totalorder %s4453_s20, %s4448_s1 }
 0x1b0   : > { %p4457_p10 = scmp.lt.u32.totalorder %s4448_s1, %s5140_s2 }
 0x1b1   : > { %p4452_p1 = pneg %p4451_p9  ;;  %p4456_p3 = por %p4455_p6, %p4454_p4 }
 0x1b3   : > { %p4458_p13 = por %p4457_p10, %p4456_p3 }
 0x1b5   : > { %p4459_p2 = pnand %p4458_p13, %p4452_p1 }
 0x1b7   : > { %4462 = shalt.err (!%p4459_p2)
}
 0x1b8   : > { %s4463_s21 = scalar_lea.vmem %s5148_s22, 256  ;;  %s4614_s28 = smov [#allocation2]  }
 0x1b9   : > { %p4464_p8 = scmp.ne.s32.totalorder %s5148_s22, %s4463_s21  ;;  %s4468_s27 = sshll.u32 %s4614_s28, 4  ;;  %s4469_s27 = int_to_ptr.vmem [resolvable:$false] %s4468_s27 }
 0x1ba   : > { %s4470_s29 = scalar_lea.vmem %s4469_s27, 512  ;;  %p4471_p12 = scmp.lt.s32.totalorder %s5148_s22, %s4469_s27 }
 0x1bb   : > { %p4466_p9 = pnand %p4464_p8, %p4450_p7  ;;  %p4472_p4 = scmp.lt.s32.totalorder %s4470_s29, %s4463_s21 }
 0x1bd   : > { %p4467_p0 = pneg %p4466_p9  ;;  %p4473_p6 = por %p4472_p4, %p4471_p12 }
 0x1bf   : > { %p4474_p3 = pnand %p4473_p6, %p4467_p0 }
 0x1c1   : > { %4477 = shalt.err (!%p4474_p3)
}
 0x1c2   : > { %s5749_s1 = smov 8   ;;  %s5750_s0 = smov 128  }
 0x1c3   : > { %3774 = dma.hbm_to_vmem [thread:$0]  (!%p5144_p5), %s5140_s2, 256, %s5148_s22, %s5150_s3, %s5750_s0, %s5750_s0, %s5749_s1  }
 0x1c4   : > { %s5751_s20 = sld [smem:[#allocation47_spill]] }
 0x1ca   : > { %p5752_p7 = scmp.ne.s32.totalorder %s5751_s20, 0 }
 0x1cb   : > { %s5753_s25 = sld [smem:[#allocation41_spill]] (!%p5752_p7) }
 0x1cc   : > { %670 = sbr.rel (%p5752_p7) target bundleno = 3179 (0xc6b), region = 88 }
 0x1d1   : > { %s5184_s23 = sand.u32 (!%p5752_p7), 1, %s5753_s25  }
 0x1d2   : > { %s3418_s21 = sshll.u32 (!%p5752_p7), %s5184_s23, 4  ;;  %s673_s28 = scalar_lea.sflag (!%p5752_p7), [#allocation3], %s5184_s23 }
 0x1d3   : > { %s5190_s4 = scalar_lea.vmem [#allocation2], %s3418_s21 }
 0x1d4   : > { %4531 = dma.done.wait (%p5119_p11), %s673_s28, 256  }
 0x1d5   : > { %4533 = vsyncadd (%p5119_p11), %s673_s28, 4294967040  ;;  %s5754_s2 = sld [smem:[#allocation46_spill]] }
 0x1db   : > { %p5755_p12 = scmp.ne.s32.totalorder %s5754_s2, 0 }
 0x1dd   : > { %4535 = dma.done.wait (%p5755_p12), [#allocation6], 32  }
 0x1de   : > { %4537 = vsyncadd (%p5755_p12), [#allocation6], 4294967264 }
 0x1df   : > { %4539 = dma.done.wait (%p5755_p12), [#allocation9], 528  }
 0x1e0   : > { %4541 = vsyncadd (%p5755_p12), [#allocation9], 4294966768 }
 0x1e1   : > { %4543 = dma.done.wait (%p5755_p12), [#allocation12], 528  }
 0x1e2   : > { %4545 = vsyncadd (%p5755_p12), [#allocation12], 4294966768 }
 0x1e3   : > { %4547 = dma.done.wait (%p5755_p12), [#allocation15], 528  }
 0x1e4   : > { %4549 = vsyncadd (%p5755_p12), [#allocation15], 4294966768 }
 0x1e5   : > { %4551 = dma.done.wait (%p5755_p12), [#allocation18], 32  }
 0x1e6   : > { %4553 = vsyncadd (%p5755_p12), [#allocation18], 4294967264 }
 0x1e7   : > { %4555 = dma.done.wait (%p5755_p12), [#allocation21], 1040  }
 0x1e8   : > { %4557 = vsyncadd (%p5755_p12), [#allocation21], 4294966256 }
 0x1e9   : > { %4559 = dma.done.wait (%p5755_p12), [#allocation24], 2080  }
 0x1ea   : > { %4561 = vsyncadd (%p5755_p12), [#allocation24], 4294965216 }
 0x1eb   : > { %4563 = dma.done.wait (%p5755_p12), [#allocation27], 32  }
 0x1ec   : > { %4565 = vsyncadd (%p5755_p12), [#allocation27], 4294967264  ;;  %vm797_vm0 = vcmask 523264   ;;  %v793_v0 = vld [vmem:[%s5190_s4] sm:$0xff]  ;;  %v794_v1 = vld [vmem:[%s5190_s4 + $0x8] sm:$0xff]  ;;  %v4615_v15 = vmov 0.0   ;;  %v1030_v56 = vlaneseq }
 0x1ed   : > { %v798_v2 = vsel %vm797_vm0, %v793_v0, 0.0  ;;  %v801_v3 = vsel %vm797_vm0, %v794_v1, 0.0  ;;  %v3910_v14 = vld [vmem:[#allocation8] sm:$0xff]   ;;  %3570 = vmatprep.subr.bf16.mxu1 %v4615_v15  ;;  %3594 = vmatprep.subr.bf16.mxu0 %v4615_v15  ;;  %v3911_v16 = vld [vmem:[#allocation8 + $0x8] sm:$0xff]   ;;  %v3912_v17 = vld [vmem:[#allocation8 + $0x10] sm:$0xff]   ;;  %vm4616_vm1 = vmmov 0  }
 0x1ee   : > { %799 = vadd.xlane.f32.xlu0 %v798_v2  ;;  %3571 = vmatpush3.bf16.msra.mxu1 %v3910_v14  ;;  %v3913_v18 = vld [vmem:[#allocation8 + $0x18] sm:$0xff]   ;;  %v3914_v35 = vld [vmem:[#allocation11] sm:$0xff]   ;;  %v3915_v37 = vld [vmem:[#allocation11 + $0x8] sm:$0xff]   ;;  %s4617_s18 = smov 112   ;;  %s4618_s22 = smov 96   ;;  %v5277_v62 = vshrl.u32 %v1030_v56, 7 }
 0x1ef   : > { %3572 = vmatprep.subr.bf16.mxu1 %v4615_v15  ;;  %3578 = vmatprep.mubr.msk.bf16.mxu1 %vm4616_vm1, %v4615_v15  ;;  %v3436_v27 = vld [vmem:[#allocation5] ss:$0 sm:$0xff]  ;;  %v3437_v31 = vld [vmem:[#allocation7] ss:$0 sm:$0xff]  ;;  %v3916_v38 = vld [vmem:[#allocation11 + $0x10] sm:$0xff]   ;;  %s4619_s3 = smov 80  }
 0x1f0   : > { %3596 = vmatprep.mubr.msk.bf16.mxu0 %vm4616_vm1, %v4615_v15  ;;  %v3917_v39 = vld [vmem:[#allocation11 + $0x18] sm:$0xff]   ;;  %v3444_v47 = vld [vmem:[#allocation13] ss:$0 sm:$0xff]  ;;  %v4620_v54 = vmov 1983009808   ;;  %vm1897_vm2 = vcmask 130048  }
 0x1f1   : > { %v3438_v40 = vld [vmem:[#allocation10] ss:$0 sm:$0xff]  ;;  %v1028_v55 = vunpack.c.l.s4 %v4620_v54  ;;  %v4621_v59 = vmov 1934713408   ;;  %s4622_s27 = smov 64   ;;  %s4623_s29 = smov 32  }
 0x1f2   : > { %802 = vadd.xlane.f32.xlu0 %v801_v3  ;;  %3573 = vmatpush3.bf16.msra.mxu1 %v3911_v16  ;;  %v1060_v60 = vunpack.c.l.s4 %v4621_v59  ;;  %s4624_s1 = smov 16   ;;  %s4625_s0 = smov 48   ;;  %vm2663_vm4 = vcmask 261120   ;;  %vm2666_vm5 = vcmask 392192  }
 0x1f3   : > { %3574 = vmatprep.subr.bf16.mxu1 %v4615_v15  ;;  %v1029_v61 = vunpack.c.0.s8 %v1028_v55  ;;  %s5756_s20 = sld [smem:[#allocation43_spill]]  ;;  %s790_s28 = scalar_lea.vmem [#allocation29], %s3418_s21 }
 0x1f4   : > { %s3143_s21 = scalar_lea.sflag [#allocation4], %s5184_s23  ;;  %p5758_p0 = scmp.ne.s32.totalorder %s5745_s26, 0 }
 0x1f5   : > { %v5284_v2 = vsub.s32 %v1029_v61, %v5277_v62 }
 0x1f6   : > { %3575 = vmatpush3.bf16.msra.mxu1 %v3912_v17 }
 0x1f7   : > { %3576 = vmatprep.subr.bf16.mxu1 %v4615_v15 }
 0x1f9   : > { %s3516_s25 = sshll.u32 %s5756_s20, 8 }
 0x1fa   : > { %3577 = vmatpush3.bf16.msra.mxu1 %v3913_v18 }
 0x1fb   : > { %3582 = vmatprep.subr.bf16.mxu1 %v4615_v15 }
 0x27b   : > { %v800_v4 = vpop.xlane.xlu0 %799 }
 0x27c   : > { %v805_v5 = vmul.f32 0.015625, %v800_v4 }
 0x27e   : > { %v807_v6 = vsub.f32 %v793_v0, %v805_v5 }
 0x27f   : > { %v803_v7 = vpop.xlane.xlu0 %802 }
 0x280   : > { %v806_v8 = vmul.f32 0.015625, %v803_v7  ;;  %v809_v9 = vmul.f32 %v807_v6, %v807_v6 }
 0x282   : > { %v808_v10 = vsub.f32 %v794_v1, %v806_v8  ;;  %v811_v11 = vsel %vm797_vm0, %v809_v9, 0.0  ;;  %v1061_v1 = vunpack.c.0.s8 %v1060_v60 }
 0x283   : > { %812 = vadd.xlane.f32.xlu1 %v811_v11 }
 0x284   : > { %v810_v12 = vmul.f32 %v808_v10, %v808_v10  ;;  %v5299_v9 = vsub.s32 %v1061_v1, %v5277_v62 }
 0x286   : > { %v814_v13 = vsel %vm797_vm0, %v810_v12, 0.0 }
 0x287   : > { %815 = vadd.xlane.f32.xlu1 %v814_v13 }
 0x310   : > { %v813_v19 = vpop.xlane.xlu1 %812 }
 0x311   : > { %v817_v20 = vmul.f32 0.015625, %v813_v19 }
 0x313   : > { %v819_v21 = vadd.f32 1e-06, %v817_v20 }
 0x314   : > { %v816_v22 = vpop.xlane.xlu1 %815 }
 0x315   : > { %3950 = vrsqrt.f32 %v819_v21  ;;  %v818_v23 = vmul.f32 0.015625, %v816_v22 }
 0x317   : > { %v820_v24 = vadd.f32 1e-06, %v818_v23 }
 0x319   : > { %3952 = vrsqrt.f32 %v820_v24 }
 0x31f   : > { %v3951_v25 = vpop.eup %3950 }
 0x320   : > { %v823_v26 = vmul.f32 %v3951_v25, %v807_v6 }
 0x322   : > { %v831_v30 = vmul.f32 %v3436_v27, %v823_v26 }
 0x323   : > { %v3953_v28 = vpop.eup %3952 }
 0x324   : > { %v824_v29 = vmul.f32 %v3953_v28, %v808_v10  ;;  %v839_v33 = vadd.f32 %v3437_v31, %v831_v30 }
 0x326   : > { %v832_v32 = vmul.f32 %v3436_v27, %v824_v29 }
 0x328   : > { %v840_v34 = vadd.f32 %v3437_v31, %v832_v32 }
 0x32a   : > { %v841_v36 = vpack.c.bf16 %v840_v34, %v839_v33 }
 0x32c   : > { %3579 = vmatmul.mubr.msk.bf16.vlgmr.msra.gmra.mrb[0].mxu1 %vm797_vm0, %v841_v36 }
 0x32d   : > { %3583 = vmatpush3.bf16.msra.mxu1 %v3914_v35  ;;  %3590 = vmatprep.mubr.msk.bf16.mxu1 %vm4616_vm1, %v4615_v15 }
 0x32e   : > { %3584 = vmatprep.subr.bf16.mxu1 %v4615_v15 }
 0x331   : > { %3585 = vmatpush3.bf16.msra.mxu1 %v3915_v37 }
 0x332   : > { %3586 = vmatprep.subr.bf16.mxu1 %v4615_v15 }
 0x335   : > { %3587 = vmatpush3.bf16.msra.mxu1 %v3916_v38 }
 0x336   : > { %3588 = vmatprep.subr.bf16.mxu1 %v4615_v15 }
 0x339   : > { %3589 = vmatpush3.bf16.msra.mxu1 %v3917_v39 }
 0x33a   : > { %3600 = vmatprep.subr.bf16.mxu1 %v4615_v15 }
 0x33c   : > { %3591 = vmatmul.mubr.msk.bf16.vlgmr.msra.gmra.mrb[4].mxu1 %vm797_vm0, %v841_v36 }
 0x33d   : > { %3602 = vmatprep.mubr.msk.bf16.mxu1 %vm4616_vm1, %v4615_v15 }
 0x3ff   : > { %v918_v41 = vpop.f32.mrb[0].mxu1 }
 0x400   : > { %v5254_v42 = vadd.f32 %v3438_v40, %v918_v41  ;;  %v3580_v43 = vpop.f32.mrb[1].mxu1 }
 0x401   : > { %v921_v44 = vpop.f32.mrb[2].mxu1 }
 0x402   : > { %v5256_v45 = vadd.f32 %v3438_v40, %v921_v44  ;;  %1007 = vrot.lane.b32.xlu0 %v5254_v42, %s4617_s18  ;;  %v3581_v46 = vpop.f32.mrb[3].mxu1 }
 0x404   : > { %1009 = vrot.lane.b32.xlu1 %v5256_v45, %s4617_s18 }
 0x40f   : > { %v998_v48 = vpop.f32.mrb[4].mxu1 }
 0x410   : > { %v5260_v49 = vadd.f32 %v3444_v47, %v998_v48  ;;  %v3592_v50 = vpop.f32.mrb[5].mxu1 }
 0x411   : > { %v1001_v51 = vpop.f32.mrb[6].mxu1 }
 0x412   : > { %1309 = vrot.lane.b32.xlu1 %v5260_v49, %s4618_s22  ;;  %1303 = vrot.lane.b32.xlu0 %v5260_v49, %s4617_s18  ;;  %v3593_v52 = vpop.f32.mrb[7].mxu1  ;;  %v5264_v53 = vadd.f32 %v3444_v47, %v1001_v51 }
 0x416   : > { %1315 = vrot.lane.b32.xlu0 %v5260_v49, %s4619_s3  ;;  %1305 = vrot.lane.b32.xlu1 %v5264_v53, %s4617_s18 }
 0x41a   : > { %1013 = vrot.lane.b32.xlu0 %v5254_v42, %s4618_s22  ;;  %1311 = vrot.lane.b32.xlu1 %v5264_v53, %s4618_s22 }
 0x41e   : > { %1019 = vrot.lane.b32.xlu0 %v5254_v42, %s4619_s3  ;;  %1317 = vrot.lane.b32.xlu1 %v5264_v53, %s4619_s3 }
 0x422   : > { %1015 = vrot.lane.b32.xlu1 %v5256_v45, %s4618_s22  ;;  %s5757_s22 = sld [smem:[#allocation53_spill]] }
 0x426   : > { %1021 = vrot.lane.b32.xlu1 %v5256_v45, %s4619_s3 }
 0x428   : > { %s5619_s3 = scalar_lea.hbm %s5757_s22, %s3516_s25 }
 0x474   : > { %v1008_v57 = vpop.permute.xlu0 %1007 }
 0x476   : > { %v5274_v58 = vpop.permute.xlu1 %1009 }
 0x484   : > { %v5279_v63 = vpop.permute.xlu1 %1309  ;;  %v5281_v0 = vpop.permute.xlu0 %1303 }
 0x485   : > { %v1321_v3 = vcombine.low %v5260_v49, %v5279_v63  ;;  %v1322_v4 = vcombine.high %v5260_v49, %v5279_v63 }
 0x487   : > { %v1329_v10 = vrot.slane %v1321_v3, %v5284_v2  ;;  %v1336_v11 = vrot.slane %v1322_v4, %v5284_v2 }
 0x488   : > { %v5290_v5 = vpop.permute.xlu0 %1315  ;;  %v5292_v6 = vpop.permute.xlu1 %1305 }
 0x489   : > { %v1337_v7 = vcombine.low %v5281_v0, %v5290_v5  ;;  %v1338_v8 = vcombine.high %v5281_v0, %v5290_v5 }
 0x48b   : > { %v1345_v12 = vrot.slane %v1337_v7, %v5284_v2  ;;  %v1352_v13 = vrot.slane %v1338_v8, %v5284_v2 }
 0x48c   : > { %v1014_v14 = vpop.permute.xlu0 %1013  ;;  %v5305_v16 = vpop.permute.xlu1 %1311 }
 0x48d   : > { %v1353_v17 = vcombine.low %v1329_v10, %v1345_v12  ;;  %v1354_v18 = vcombine.high %v1329_v10, %v1345_v12  ;;  %v1369_v19 = vcombine.low %v1336_v11, %v1352_v13  ;;  %v1370_v20 = vcombine.high %v1336_v11, %v1352_v13 }
 0x48e   : > { %v1025_v21 = vcombine.low %v5254_v42, %v1014_v14  ;;  %v1026_v22 = vcombine.high %v5254_v42, %v1014_v14  ;;  %v1389_v23 = vcombine.low %v5264_v53, %v5305_v16  ;;  %v1390_v24 = vcombine.high %v5264_v53, %v5305_v16 }
 0x48f   : > { %v1361_v25 = vrot.slane %v1353_v17, %v5299_v9  ;;  %v1368_v26 = vrot.slane %v1354_v18, %v5299_v9  ;;  %v1377_v27 = vrot.slane %v1369_v19, %v5299_v9  ;;  %v1384_v28 = vrot.slane %v1370_v20, %v5299_v9 }
 0x490   : > { %v1020_v29 = vpop.permute.xlu0 %1019  ;;  %v5317_v30 = vpop.permute.xlu1 %1317  ;;  %v1033_v39 = vrot.slane %v1025_v21, %v5284_v2  ;;  %v1040_v40 = vrot.slane %v1026_v22, %v5284_v2  ;;  %v1397_v41 = vrot.slane %v1389_v23, %v5284_v2  ;;  %v1404_v42 = vrot.slane %v1390_v24, %v5284_v2 }
 0x491   : > { %v1457_v31 = vcombine.low %v1361_v25, %v1368_v26  ;;  %v3454_v32 = vcombine.high %v1361_v25, %v1368_v26  ;;  %v1473_v33 = vcombine.low %v1377_v27, %v1384_v28  ;;  %v3455_v34 = vcombine.high %v1377_v27, %v1384_v28 }
 0x492   : > { %v1041_v35 = vcombine.low %v1008_v57, %v1020_v29  ;;  %v1042_v36 = vcombine.high %v1008_v57, %v1020_v29  ;;  %v1405_v37 = vcombine.low %v5292_v6, %v5317_v30  ;;  %v1406_v38 = vcombine.high %v5292_v6, %v5317_v30 }
 0x493   : > { %v5332_v50 = vrot.slane %v1457_v31, %v5284_v2  ;;  %v5335_v51 = vrot.slane %v3454_v32, %v5284_v2  ;;  %v5338_v52 = vrot.slane %v1473_v33, %v5284_v2  ;;  %v5341_v54 = vrot.slane %v3455_v34, %v5284_v2 }
 0x494   : > { %v1049_v43 = vrot.slane %v1041_v35, %v5284_v2  ;;  %v1056_v44 = vrot.slane %v1042_v36, %v5284_v2  ;;  %v1413_v46 = vrot.slane %v1405_v37, %v5284_v2  ;;  %v1420_v47 = vrot.slane %v1406_v38, %v5284_v2  ;;  %v1016_v48 = vpop.permute.xlu1 %1015 }
 0x495   : > { %v1093_v19 = vcombine.low %v5256_v45, %v1016_v48  ;;  %v1094_v20 = vcombine.high %v5256_v45, %v1016_v48  ;;  %v1489_v26 = vcombine.low %v5332_v50, %v5335_v51  ;;  %v1505_v27 = vcombine.low %v5338_v52, %v5341_v54 }
 0x496   : > { %v1057_v55 = vcombine.low %v1033_v39, %v1049_v43  ;;  %v1058_v57 = vcombine.high %v1033_v39, %v1049_v43  ;;  %v1073_v59 = vcombine.low %v1040_v40, %v1056_v44  ;;  %v1074_v60 = vcombine.high %v1040_v40, %v1056_v44 }
 0x497   : > { %v1421_v61 = vcombine.low %v1397_v41, %v1413_v46  ;;  %v1422_v1 = vcombine.high %v1397_v41, %v1413_v46  ;;  %v1437_v3 = vcombine.low %v1404_v42, %v1420_v47  ;;  %v1438_v4 = vcombine.high %v1404_v42, %v1420_v47 }
 0x498   : > { %v1065_v7 = vrot.slane %v1057_v55, %v5299_v9  ;;  %v1072_v8 = vrot.slane %v1058_v57, %v5299_v9  ;;  %v1081_v10 = vrot.slane %v1073_v59, %v5299_v9  ;;  %v1088_v11 = vrot.slane %v1074_v60, %v5299_v9  ;;  %v1022_v21 = vpop.permute.xlu1 %1021 }
 0x499   : > { %v1429_v12 = vrot.slane %v1421_v61, %v5299_v9  ;;  %v1436_v13 = vrot.slane %v1422_v1, %v5299_v9  ;;  %v1445_v14 = vrot.slane %v1437_v3, %v5299_v9  ;;  %v1452_v17 = vrot.slane %v1438_v4, %v5299_v9 }
 0x49a   : > { %v1161_v18 = vcombine.low %v1065_v7, %v1072_v8  ;;  %v3450_v24 = vcombine.high %v1065_v7, %v1072_v8  ;;  %v1177_v28 = vcombine.low %v1081_v10, %v1088_v11  ;;  %v3451_v29 = vcombine.high %v1081_v10, %v1088_v11 }
 0x49b   : > { %v1525_v22 = vcombine.low %v1429_v12, %v1436_v13  ;;  %v3456_v23 = vcombine.high %v1429_v12, %v1436_v13  ;;  %v1541_v25 = vcombine.low %v1445_v14, %v1452_v17  ;;  %v1109_v31 = vcombine.low %v5274_v58, %v1022_v21 }
 0x49c   : > { %v1110_v32 = vcombine.high %v5274_v58, %v1022_v21  ;;  %v5360_v33 = vrot.slane %v1161_v18, %v5284_v2  ;;  %v3457_v45 = vcombine.high %v1445_v14, %v1452_v17  ;;  %v1101_v34 = vrot.slane %v1093_v19, %v5284_v2 }
 0x49d   : > { %v1108_v35 = vrot.slane %v1094_v20, %v5284_v2  ;;  %v1117_v36 = vrot.slane %v1109_v31, %v5284_v2  ;;  %v1532_v38 = vrot.slane %v1525_v22, %v5284_v2  ;;  %v1540_v39 = vrot.slane %v3456_v23, %v5284_v2 }
 0x49e   : > { %v1124_v37 = vrot.slane %v1110_v32, %v5284_v2  ;;  %v5369_v40 = vrot.slane %v3450_v24, %v5284_v2  ;;  %v1497_v58 = vrot.slane %v1489_v26, %v5299_v9  ;;  %v1513_v41 = vrot.slane %v1505_v27, %v5299_v9 }
 0x49f   : > { %v1548_v42 = vrot.slane %v1541_v25, %v5284_v2  ;;  %v1125_v43 = vcombine.low %v1101_v34, %v1117_v36  ;;  %v1126_v44 = vcombine.high %v1101_v34, %v1117_v36  ;;  %v5375_v48 = vrot.slane %v1177_v28, %v5284_v2 }
 0x4a0   : > { %v1141_v46 = vcombine.low %v1108_v35, %v1124_v37  ;;  %v1142_v47 = vcombine.high %v1108_v35, %v1124_v37  ;;  %v5378_v55 = vrot.slane %v3451_v29, %v5284_v2  ;;  %v1556_v57 = vrot.slane %v3457_v45, %v5284_v2 }
 0x4a1   : > { %v1557_v59 = vcombine.low %v1532_v38, %v1540_v39  ;;  %v1133_v60 = vrot.slane %v1125_v43, %v5299_v9  ;;  %v1140_v61 = vrot.slane %v1126_v44, %v5299_v9  ;;  %v1521_v4 = vcombine.low %v1497_v58, %v1513_v41 }
 0x4a2   : > { %v1149_v1 = vrot.slane %v1141_v46, %v5299_v9  ;;  %v1156_v3 = vrot.slane %v1142_v47, %v5299_v9  ;;  %v1573_v8 = vcombine.low %v1548_v42, %v1556_v57  ;;  %v1193_v17 = vcombine.low %v5360_v33, %v5369_v40 }
 0x4a3   : > { %v1565_v7 = vrot.slane %v1557_v59, %v5299_v9  ;;  %v1229_v10 = vcombine.low %v1133_v60, %v1140_v61  ;;  %v3452_v11 = vcombine.high %v1133_v60, %v1140_v61  ;;  %v1209_v18 = vcombine.low %v5375_v48, %v5378_v55 }
 0x4a4   : > { %v1245_v12 = vcombine.low %v1149_v1, %v1156_v3  ;;  %v3453_v13 = vcombine.high %v1149_v1, %v1156_v3  ;;  %v1581_v14 = vrot.slane %v1573_v8, %v5299_v9  ;;  %v1490_v19 = vcombine.high %v5332_v50, %v5335_v51 }
 0x4a5   : > { %v1236_v20 = vrot.slane %v1229_v10, %v5284_v2  ;;  %v1244_v21 = vrot.slane %v3452_v11, %v5284_v2  ;;  %v1522_v25 = vcombine.high %v1497_v58, %v1513_v41  ;;  %v1506_v27 = vcombine.high %v5338_v52, %v5341_v54 }
 0x4a6   : > { %v1252_v22 = vrot.slane %v1245_v12, %v5284_v2  ;;  %v1260_v23 = vrot.slane %v3453_v13, %v5284_v2  ;;  %v1589_v24 = vcombine.low %v1565_v7, %v1581_v14  ;;  %v1590_v26 = vcombine.high %v1565_v7, %v1581_v14 }
 0x4a7   : > { %v1261_v28 = vcombine.low %v1236_v20, %v1244_v21  ;;  %v1201_v50 = vrot.slane %v1193_v17, %v5299_v9  ;;  %v1217_v51 = vrot.slane %v1209_v18, %v5299_v9  ;;  %v1504_v35 = vrot.slane %v1490_v19, %v5299_v9 }
 0x4a8   : > { %v1277_v29 = vcombine.low %v1252_v22, %v1260_v23  ;;  %v1593_v31 = vpack.c.bf16 %v1589_v24, %v1521_v4  ;;  %v1594_v32 = vpack.c.bf16 %v1590_v26, %v1522_v25  ;;  %v1520_v52 = vrot.slane %v1506_v27, %v5299_v9 }
 0x4a9   : > { %v1269_v45 = vrot.slane %v1261_v28, %v5299_v9  ;;  %v1558_v54 = vcombine.high %v1532_v38, %v1540_v39  ;;  %v1574_v43 = vcombine.high %v1548_v42, %v1556_v57  ;;  %v1225_v44 = vcombine.low %v1201_v50, %v1217_v51 }
 0x4aa   : > { %v1285_v34 = vrot.slane %v1277_v29, %v5299_v9  ;;  %v1902_v36 = vsel %vm1897_vm2, %v1593_v31, 0  ;;  %v1949_v37 = vsel %vm1897_vm2, %v1594_v32, 0  ;;  %v1226_v46 = vcombine.high %v1201_v50, %v1217_v51 }
 0x4ab   : > { %3595 = vmatpush3.bf16.xpose.msra.mxu0 %v1902_v36  ;;  %3601 = vmatpush3.bf16.xpose.msra.mxu1 %v1949_v37  ;;  %v1572_v47 = vrot.slane %v1558_v54, %v5299_v9  ;;  %v1262_v59 = vcombine.high %v1236_v20, %v1244_v21  ;;  %v1278_v60 = vcombine.high %v1252_v22, %v1260_v23  ;;  %v2087_v21 = vand.u32 127, %v1030_v56 }
 0x4ac   : > { %v1293_v58 = vcombine.low %v1269_v45, %v1285_v34  ;;  %v1294_v41 = vcombine.high %v1269_v45, %v1285_v34  ;;  %3606 = vmatprep.subr.bf16.mxu0 %v4615_v15  ;;  %3612 = vmatprep.subr.bf16.mxu1 %v4615_v15  ;;  %v1588_v61 = vrot.slane %v1574_v43, %v5299_v9 }
 0x4ad   : > { %v1194_v38 = vcombine.high %v5360_v33, %v5369_v40  ;;  %v1210_v39 = vcombine.high %v5375_v48, %v5378_v55  ;;  %v1523_v57 = vcombine.low %v1504_v35, %v1520_v52  ;;  %v1524_v4 = vcombine.high %v1504_v35, %v1520_v52 }
 0x4ae   : > { %v1297_v1 = vpack.c.bf16 %v1293_v58, %v1225_v44  ;;  %v1298_v42 = vpack.c.bf16 %v1294_v41, %v1226_v46  ;;  %v1591_v3 = vcombine.low %v1572_v47, %v1588_v61  ;;  %v1592_v7 = vcombine.high %v1572_v47, %v1588_v61 }
 0x4af   : > { %v1276_v8 = vrot.slane %v1262_v59, %v5299_v9  ;;  %v1292_v10 = vrot.slane %v1278_v60, %v5299_v9  ;;  %v1208_v33 = vrot.slane %v1194_v38, %v5299_v9  ;;  %v1224_v40 = vrot.slane %v1210_v39, %v5299_v9 }
 0x4b0   : > { %v1595_v11 = vpack.c.bf16 %v1591_v3, %v1523_v57  ;;  %v1596_v12 = vpack.c.bf16 %v1592_v7, %v1524_v4  ;;  %vm2088_vm3 = vcmp.lt.s32.totalorder %v2087_v21, 12 }
 0x4b1   : > { %v1295_v13 = vcombine.low %v1276_v8, %v1292_v10  ;;  %v1296_v14 = vcombine.high %v1276_v8, %v1292_v10  ;;  %v1227_v17 = vcombine.low %v1208_v33, %v1224_v40  ;;  %v1228_v18 = vcombine.high %v1208_v33, %v1224_v40 }
 0x4b2   : > { %3597 = vmatmul.mubr.msk.bf16.vlgmr.msra.gmra.mrb[0].mxu0 %vm1897_vm2, %v1297_v1  ;;  %3603 = vmatmul.mubr.msk.bf16.vlgmr.msra.gmra.mrb[8].mxu1 %vm1897_vm2, %v1298_v42  ;;  %v1996_v48 = vsel %vm1897_vm2, %v1595_v11, 0  ;;  %v2043_v55 = vsel %vm1897_vm2, %v1596_v12, 0 }
 0x4b3   : > { %3608 = vmatprep.mubr.msk.bf16.mxu0 %vm4616_vm1, %v4615_v15  ;;  %3614 = vmatprep.mubr.msk.bf16.mxu1 %vm4616_vm1, %v4615_v15  ;;  %v1299_v19 = vpack.c.bf16 %v1295_v13, %v1227_v17  ;;  %v1300_v20 = vpack.c.bf16 %v1296_v14, %v1228_v18 }
 0x4b4   : > { %3607 = vmatpush3.bf16.xpose.msra.mxu0 %v1996_v48  ;;  %3613 = vmatpush3.bf16.xpose.msra.mxu1 %v2043_v55 }
 0x4b5   : > { %3618 = vmatprep.subr.bf16.mxu0 %v4615_v15  ;;  %3624 = vmatprep.subr.bf16.mxu1 %v4615_v15 }
 0x4bb   : > { %3609 = vmatmul.mubr.msk.bf16.vlgmr.msra.gmra.mrb[4].mxu0 %vm1897_vm2, %v1299_v19  ;;  %3615 = vmatmul.mubr.msk.bf16.vlgmr.msra.gmra.mrb[12].mxu1 %vm1897_vm2, %v1300_v20 }
 0x4bc   : > { %3620 = vmatprep.mubr.msk.bf16.mxu0 %vm4616_vm1, %v4615_v15  ;;  %3626 = vmatprep.mubr.msk.bf16.mxu1 %vm4616_vm1, %v4615_v15 }
 0x585   : > { %v1938_v22 = vpop.f32.mrb[0].mxu0  ;;  %v1985_v23 = vpop.f32.mrb[8].mxu1 }
 0x586   : > { %v2089_v24 = vsel %vm2088_vm3, %v1938_v22, -1e+30  ;;  %v3598_v25 = vpop.f32.mrb[1].mxu0  ;;  %v3604_v26 = vpop.f32.mrb[9].mxu1  ;;  %v2091_v31 = vsel %vm2088_vm3, %v1985_v23, -1e+30 }
 0x587   : > { %v1941_v27 = vpop.f32.mrb[2].mxu0  ;;  %v1988_v28 = vpop.f32.mrb[10].mxu1  ;;  %v2097_v29 = vsel %vm1897_vm2, %v2089_v24, -inf  ;;  %v2103_v45 = vsel %vm1897_vm2, %v2091_v31, -inf }
 0x588   : > { %v2090_v32 = vsel %vm2088_vm3, %v1941_v27, -1e+30  ;;  %2098 = vmax.xlane.f32.xlu0 %v2097_v29  ;;  %v3599_v50 = vpop.f32.mrb[3].mxu0  ;;  %v3605_v51 = vpop.f32.mrb[11].mxu1  ;;  %v2092_v34 = vsel %vm2088_vm3, %v1988_v28, -1e+30 }
 0x589   : > { %v2100_v56 = vsel %vm1897_vm2, %v2090_v32, -inf  ;;  %v2106_v54 = vsel %vm1897_vm2, %v2092_v34, -inf }
 0x58a   : > { %2101 = vmax.xlane.f32.xlu1 %v2100_v56 }
 0x58c   : > { %2104 = vmax.xlane.f32.xlu0 %v2103_v45 }
 0x58e   : > { %v2032_v35 = vpop.f32.mrb[4].mxu0  ;;  %v2079_v36 = vpop.f32.mrb[12].mxu1 }
 0x58f   : > { %v3610_v37 = vpop.f32.mrb[5].mxu0  ;;  %v3616_v52 = vpop.f32.mrb[13].mxu1  ;;  %v2093_v58 = vsel %vm2088_vm3, %v2032_v35, -1e+30  ;;  %v2095_v60 = vsel %vm2088_vm3, %v2079_v36, -1e+30 }
 0x590   : > { %v2035_v41 = vpop.f32.mrb[6].mxu0  ;;  %v2082_v43 = vpop.f32.mrb[14].mxu1  ;;  %2107 = vmax.xlane.f32.xlu0 %v2106_v54  ;;  %v2109_v59 = vsel %vm1897_vm2, %v2093_v58, -inf  ;;  %v2115_v61 = vsel %vm1897_vm2, %v2095_v60, -inf }
 0x591   : > { %v5446_v44 = vsel %vm2088_vm3, %v2082_v43, -1e+30  ;;  %v3611_v46 = vpop.f32.mrb[7].mxu0  ;;  %v3617_v47 = vpop.f32.mrb[15].mxu1  ;;  %v2094_v38 = vsel %vm2088_vm3, %v2035_v41, -1e+30 }
 0x592   : > { %v2112_v39 = vsel %vm1897_vm2, %v2094_v38, -inf }
 0x594   : > { %2110 = vmax.xlane.f32.xlu0 %v2109_v59 }
 0x598   : > { %2116 = vmax.xlane.f32.xlu0 %v2115_v61 }
 0x59b   : > { %1599 = vrot.lane.b32.xlu1 %v5264_v53, %s4622_s27  ;;  %v2118_v53 = vsel %vm1897_vm2, %v5446_v44, -inf }
 0x59f   : > { %1601 = vrot.lane.b32.xlu1 %v5281_v0, %s4622_s27 }
 0x5a3   : > { %1603 = vrot.lane.b32.xlu1 %v5292_v6, %s4622_s27 }
 0x5ae   : > { %1597 = vrot.lane.b32.xlu0 %v5260_v49, %s4622_s27 }
 0x5b2   : > { %1605 = vrot.lane.b32.xlu0 %v5279_v63, %s4622_s27 }
 0x5b6   : > { %1609 = vrot.lane.b32.xlu0 %v5290_v5, %s4622_s27 }
 0x5c7   : > { %2113 = vmax.xlane.f32.xlu1 %v2112_v39 }
 0x5cb   : > { %2119 = vmax.xlane.f32.xlu1 %v2118_v53 }
 0x5dc   : > { %1607 = vrot.lane.b32.xlu1 %v5305_v16, %s4622_s27 }
 0x615   : > { %v2099_v0 = vpop.xlane.xlu0 %2098 }
 0x616   : > { %v2121_v49 = vsub.f32 %v2089_v24, %v2099_v0 }
 0x617   : > { %v2102_v6 = vpop.xlane.xlu1 %2101 }
 0x618   : > { %v2129_v1 = vmul.f32 1.442695, %v2121_v49  ;;  %v2122_v63 = vsub.f32 %v2090_v32, %v2102_v6 }
 0x619   : > { %v2105_v42 = vpop.xlane.xlu0 %2104 }
 0x61a   : > { %3954 = vpow2.f32 %v2129_v1  ;;  %v2131_v5 = vmul.f32 1.442695, %v2122_v63  ;;  %v2123_v57 = vsub.f32 %v2091_v31, %v2105_v42 }
 0x61b   : > { %v1600_v25 = vpop.permute.xlu1 %1599 }
 0x61c   : > { %3956 = vpow2.f32 %v2131_v5  ;;  %v2133_v3 = vmul.f32 1.442695, %v2123_v57 }
 0x61d   : > { %v2108_v4 = vpop.xlane.xlu0 %2107 }
 0x61e   : > { %3958 = vpow2.f32 %v2133_v3  ;;  %v2124_v7 = vsub.f32 %v2092_v34, %v2108_v4 }
 0x61f   : > { %v1602_v26 = vpop.permute.xlu1 %1601 }
 0x620   : > { %v2135_v8 = vmul.f32 1.442695, %v2124_v7 }
 0x621   : > { %v2111_v10 = vpop.xlane.xlu0 %2110 }
 0x622   : > { %3960 = vpow2.f32 %v2135_v8  ;;  %v2125_v11 = vsub.f32 %v2093_v58, %v2111_v10 }
 0x623   : > { %v1604_v27 = vpop.permute.xlu1 %1603 }
 0x624   : > { %v5469_v12 = vpop.eup %3954  ;;  %v2137_v16 = vmul.f32 1.442695, %v2125_v11 }
 0x625   : > { %v2117_v33 = vpop.xlane.xlu0 %2116  ;;  %v2145_v40 = vsel %vm1897_vm2, %v5469_v12, 0.0 }
 0x626   : > { %v5473_v48 = vpop.eup %3956  ;;  %3962 = vpow2.f32 %v2137_v16  ;;  %v2127_v55 = vsub.f32 %v2095_v60, %v2117_v33  ;;  %2146 = vadd.xlane.f32.xlu0 %v2145_v40 }
 0x627   : > { %v2148_v13 = vsel %vm1897_vm2, %v5473_v48, 0.0 }
 0x628   : > { %v5477_v14 = vpop.eup %3958  ;;  %v2141_v17 = vmul.f32 1.442695, %v2127_v55  ;;  %2149 = vadd.xlane.f32.xlu1 %v2148_v13 }
 0x629   : > { %v2151_v18 = vsel %vm1897_vm2, %v5477_v14, 0.0  ;;  %v1598_v35 = vpop.permute.xlu0 %1597 }
 0x62a   : > { %3964 = vpow2.f32 %v2141_v17  ;;  %2152 = vadd.xlane.f32.xlu0 %v2151_v18 }
 0x62c   : > { %v5481_v19 = vpop.eup %3960 }
 0x62d   : > { %v2154_v20 = vsel %vm1897_vm2, %v5481_v19, 0.0  ;;  %v1606_v36 = vpop.permute.xlu0 %1605 }
 0x62e   : > { %2155 = vadd.xlane.f32.xlu1 %v2154_v20  ;;  %v1621_v54 = vcombine.low %v1598_v35, %v1606_v36  ;;  %v1622_v41 = vcombine.high %v1598_v35, %v1606_v36 }
 0x630   : > { %v5485_v21 = vpop.eup %3962  ;;  %v1636_v59 = vrot.slane %v1622_v41, %v5284_v2 }
 0x631   : > { %v2157_v22 = vsel %vm1897_vm2, %v5485_v21, 0.0  ;;  %v1610_v37 = vpop.permute.xlu0 %1609 }
 0x632   : > { %2158 = vadd.xlane.f32.xlu0 %v2157_v22  ;;  %v1637_v52 = vcombine.low %v1602_v26, %v1610_v37  ;;  %v1638_v58 = vcombine.high %v1602_v26, %v1610_v37 }
 0x634   : > { %v5489_v23 = vpop.eup %3964  ;;  %v1645_v43 = vrot.slane %v1637_v52, %v5284_v2  ;;  %v1652_v46 = vrot.slane %v1638_v58, %v5284_v2 }
 0x635   : > { %v2163_v24 = vsel %vm1897_vm2, %v5489_v23, 0.0 }
 0x636   : > { %2164 = vadd.xlane.f32.xlu0 %v2163_v24  ;;  %v1670_v39 = vcombine.high %v1636_v59, %v1652_v46 }
 0x638   : > { %v1684_v1 = vrot.slane %v1670_v39, %v5299_v9 }
 0x63f   : > { %1611 = vrot.lane.b32.xlu1 %v5317_v30, %s4622_s27 }
 0x654   : > { %v2114_v28 = vpop.xlane.xlu1 %2113 }
 0x655   : > { %v2126_v29 = vsub.f32 %v2094_v38, %v2114_v28  ;;  %v1669_v38 = vcombine.low %v1636_v59, %v1652_v46 }
 0x657   : > { %v2139_v31 = vmul.f32 1.442695, %v2126_v29  ;;  %v1677_v6 = vrot.slane %v1669_v38, %v5299_v9 }
 0x658   : > { %v2120_v32 = vpop.xlane.xlu1 %2119 }
 0x659   : > { %3966 = vpow2.f32 %v2139_v31  ;;  %v2128_v50 = vsub.f32 %v5446_v44, %v2120_v32  ;;  %v1629_v44 = vrot.slane %v1621_v54, %v5284_v2  ;;  %v1773_v7 = vcombine.low %v1677_v6, %v1684_v1 }
 0x65a   : > { %v3459_v8 = vcombine.high %v1677_v6, %v1684_v1 }
 0x65b   : > { %v2143_v51 = vmul.f32 1.442695, %v2128_v50  ;;  %v1653_v60 = vcombine.low %v1629_v44, %v1645_v43  ;;  %v1654_v61 = vcombine.high %v1629_v44, %v1645_v43  ;;  %v1780_v22 = vrot.slane %v1773_v7, %v5284_v2 }
 0x65c   : > { %v1608_v47 = vpop.permute.xlu1 %1607  ;;  %v1788_v24 = vrot.slane %v3459_v8, %v5284_v2 }
 0x65d   : > { %3968 = vpow2.f32 %v2143_v51  ;;  %v1661_v0 = vrot.slane %v1653_v60, %v5299_v9  ;;  %v1668_v49 = vrot.slane %v1654_v61, %v5299_v9  ;;  %v1689_v57 = vcombine.low %v1600_v25, %v1608_v47 }
 0x65e   : > { %v1690_v3 = vcombine.high %v1600_v25, %v1608_v47  ;;  %v1806_v35 = vcombine.high %v1780_v22, %v1788_v24 }
 0x65f   : > { %v1757_v5 = vcombine.low %v1661_v0, %v1668_v49  ;;  %v3458_v4 = vcombine.high %v1661_v0, %v1668_v49  ;;  %v1697_v40 = vrot.slane %v1689_v57, %v5284_v2 }
 0x660   : > { %v1704_v55 = vrot.slane %v1690_v3, %v5284_v2  ;;  %v1820_v61 = vrot.slane %v1806_v35, %v5299_v9 }
 0x661   : > { %v1764_v33 = vrot.slane %v1757_v5, %v5284_v2  ;;  %v1772_v20 = vrot.slane %v3458_v4, %v5284_v2 }
 0x663   : > { %v5496_v56 = vpop.eup %3966  ;;  %v1789_v51 = vcombine.low %v1764_v33, %v1772_v20 }
 0x664   : > { %v2160_v45 = vsel %vm1897_vm2, %v5496_v56, 0.0 }
 0x665   : > { %2161 = vadd.xlane.f32.xlu1 %v2160_v45  ;;  %v1805_v45 = vcombine.low %v1780_v22, %v1788_v24  ;;  %v1797_v47 = vrot.slane %v1789_v51, %v5299_v9 }
 0x667   : > { %v5500_v34 = vpop.eup %3968  ;;  %v1813_v59 = vrot.slane %v1805_v45, %v5299_v9 }
 0x668   : > { %v2166_v30 = vsel %vm1897_vm2, %v5500_v34, 0.0 }
 0x669   : > { %2167 = vadd.xlane.f32.xlu0 %v2166_v30  ;;  %v1790_v30 = vcombine.high %v1764_v33, %v1772_v20  ;;  %v1821_v3 = vcombine.low %v1797_v47, %v1813_v59  ;;  %v1822_v4 = vcombine.high %v1797_v47, %v1813_v59 }
 0x66b   : > { %v1804_v60 = vrot.slane %v1790_v30, %v5299_v9 }
 0x6b3   : > { %v2147_v42 = vpop.xlane.xlu0 %2146 }
 0x6b4   : > { %3970 = vrcp.f32 %v2147_v42 }
 0x6b5   : > { %v2150_v53 = vpop.xlane.xlu1 %2149 }
 0x6b6   : > { %3972 = vrcp.f32 %v2150_v53 }
 0x6b7   : > { %v2153_v13 = vpop.xlane.xlu0 %2152 }
 0x6bb   : > { %v2156_v63 = vpop.xlane.xlu1 %2155 }
 0x6bc   : > { %3974 = vrcp.f32 %v2156_v63 }
 0x6bd   : > { %3976 = vrcp.f32 %v2153_v13 }
 0x6be   : > { %v3971_v46 = vpop.eup %3970 }
 0x6bf   : > { %v1612_v10 = vpop.permute.xlu1 %1611  ;;  %v2177_v20 = vmul.f32 %v3971_v46, %v5469_v12  ;;  %v2159_v12 = vpop.xlane.xlu0 %2158 }
 0x6c0   : > { %v1705_v11 = vcombine.low %v1604_v27, %v1612_v10  ;;  %v1706_v16 = vcombine.high %v1604_v27, %v1612_v10  ;;  %v3973_v38 = vpop.eup %3972  ;;  %v1823_v10 = vcombine.low %v1804_v60, %v1820_v61  ;;  %3978 = vrcp.f32 %v2159_v12 }
 0x6c2   : > { %v1713_v17 = vrot.slane %v1705_v11, %v5284_v2  ;;  %v1720_v18 = vrot.slane %v1706_v16, %v5284_v2  ;;  %v2178_v16 = vmul.f32 %v3973_v38, %v5473_v48 }
 0x6c3   : > { %v2165_v48 = vpop.xlane.xlu0 %2164 }
 0x6c4   : > { %v1721_v25 = vcombine.low %v1697_v40, %v1713_v17  ;;  %v1722_v26 = vcombine.high %v1697_v40, %v1713_v17  ;;  %v1737_v27 = vcombine.low %v1704_v55, %v1720_v18  ;;  %v1738_v28 = vcombine.high %v1704_v55, %v1720_v18 }
 0x6c5   : > { %v1824_v40 = vcombine.high %v1804_v60, %v1820_v61 }
 0x6c6   : > { %v1729_v29 = vrot.slane %v1721_v25, %v5299_v9  ;;  %v1736_v31 = vrot.slane %v1722_v26, %v5299_v9  ;;  %v1745_v32 = vrot.slane %v1737_v27, %v5299_v9  ;;  %v1752_v50 = vrot.slane %v1738_v28, %v5299_v9  ;;  %v3975_v6 = vpop.eup %3974 }
 0x6c7   : > { %v3977_v57 = vpop.eup %3976  ;;  %v2180_v33 = vmul.f32 %v3975_v6, %v5481_v19  ;;  %v2185_v25 = vpack.c.bf16 %v2178_v16, %v2177_v20 }
 0x6c8   : > { %v1825_v36 = vcombine.low %v1729_v29, %v1736_v31  ;;  %v3460_v37 = vcombine.high %v1729_v29, %v1736_v31  ;;  %v1841_v52 = vcombine.low %v1745_v32, %v1752_v50  ;;  %v3461_v54 = vcombine.high %v1745_v32, %v1752_v50 }
 0x6c9   : > { %v2179_v22 = vmul.f32 %v3977_v57, %v5477_v14 }
 0x6ca   : > { %v1832_v58 = vrot.slane %v1825_v36, %v5284_v2  ;;  %v1840_v41 = vrot.slane %v3460_v37, %v5284_v2  ;;  %v1848_v43 = vrot.slane %v1841_v52, %v5284_v2  ;;  %v1856_v44 = vrot.slane %v3461_v54, %v5284_v2  ;;  %v3979_v27 = vpop.eup %3978  ;;  %v3918_v36 = vld [vmem:[#allocation14] sm:$0xff]  }
 0x6cb   : > { %v2186_v26 = vpack.c.bf16 %v2180_v33, %v2179_v22  ;;  %v2181_v29 = vmul.f32 %v3979_v27, %v5485_v21  ;;  %v3919_v21 = vld [vmem:[#allocation14 + $0x8] sm:$0xff]  }
 0x6cc   : > { %v1857_v39 = vcombine.low %v1832_v58, %v1840_v41  ;;  %v1873_v53 = vcombine.low %v1848_v43, %v1856_v44  ;;  %v1858_v0 = vcombine.high %v1832_v58, %v1840_v41  ;;  %v1874_v49 = vcombine.high %v1848_v43, %v1856_v44 }
 0x6ce   : > { %v1865_v1 = vrot.slane %v1857_v39, %v5299_v9  ;;  %v1881_v63 = vrot.slane %v1873_v53, %v5299_v9  ;;  %v1872_v42 = vrot.slane %v1858_v0, %v5299_v9  ;;  %v1888_v5 = vrot.slane %v1874_v49, %v5299_v9 }
 0x6d0   : > { %v1889_v7 = vcombine.low %v1865_v1, %v1881_v63  ;;  %v1890_v8 = vcombine.high %v1865_v1, %v1881_v63  ;;  %v1891_v11 = vcombine.low %v1872_v42, %v1888_v5  ;;  %v1892_v55 = vcombine.high %v1872_v42, %v1888_v5 }
 0x6d2   : > { %v1893_v13 = vpack.c.bf16 %v1889_v7, %v1821_v3  ;;  %v1894_v17 = vpack.c.bf16 %v1890_v8, %v1822_v4  ;;  %v1895_v18 = vpack.c.bf16 %v1891_v11, %v1823_v10  ;;  %v1896_v24 = vpack.c.bf16 %v1892_v55, %v1824_v40 }
 0x6d4   : > { %3619 = vmatpush3.bf16.msra.mxu0 %v1893_v13  ;;  %3625 = vmatpush3.bf16.msra.mxu1 %v1894_v17 }
 0x6d5   : > { %3630 = vmatprep.subr.bf16.mxu0 %v4615_v15  ;;  %3636 = vmatprep.subr.bf16.mxu1 %v4615_v15 }
 0x6d7   : > { %3621 = vmatmul.mubr.msk.bf16.vlgmr.msra.gmra.mrb[8].mxu0 %vm1897_vm2, %v2185_v25  ;;  %3627 = vmatmul.mubr.msk.bf16.vlgmr.msra.gmra.mrb[16].mxu1 %vm1897_vm2, %v2186_v26 }
 0x6d8   : > { %3631 = vmatpush3.bf16.msra.mxu0 %v1895_v18  ;;  %3637 = vmatpush3.bf16.msra.mxu1 %v1896_v24 }
 0x6d9   : > { %3632 = vmatprep.mubr.msk.bf16.mxu0 %vm4616_vm1, %v4615_v15  ;;  %3638 = vmatprep.mubr.msk.bf16.mxu1 %vm4616_vm1, %v4615_v15 }
 0x6da   : > { %3642 = vmatprep.subr.bf16.mxu0 %v4615_v15 }
 0x6f2   : > { %v2162_v14 = vpop.xlane.xlu1 %2161 }
 0x6f3   : > { %3980 = vrcp.f32 %v2162_v14 }
 0x6f4   : > { %3982 = vrcp.f32 %v2165_v48 }
 0x6f6   : > { %v2168_v19 = vpop.xlane.xlu0 %2167 }
 0x6f7   : > { %3984 = vrcp.f32 %v2168_v19 }
 0x6fd   : > { %v3981_v28 = vpop.eup %3980 }
 0x6fe   : > { %v2182_v31 = vmul.f32 %v3981_v28, %v5496_v56  ;;  %v3983_v32 = vpop.eup %3982 }
 0x6ff   : > { %v2183_v45 = vmul.f32 %v3983_v32, %v5489_v23 }
 0x700   : > { %v2187_v50 = vpack.c.bf16 %v2182_v31, %v2181_v29 }
 0x701   : > { %v3985_v51 = vpop.eup %3984 }
 0x702   : > { %v2184_v30 = vmul.f32 %v3985_v51, %v5500_v34  ;;  %3633 = vmatmul.mubr.msk.bf16.vlgmr.msra.gmra.mrb[12].mxu0 %vm1897_vm2, %v2187_v50 }
 0x703   : > { %3650 = vmatprep.mubr.msk.bf16.mxu0 %vm4616_vm1, %v4615_v15  ;;  %3643 = vmatpush3.bf16.msra.mxu0 %v3918_v36 }
 0x704   : > { %v2188_v35 = vpack.c.bf16 %v2184_v30, %v2183_v45  ;;  %3644 = vmatprep.subr.bf16.mxu0 %v4615_v15 }
 0x706   : > { %3639 = vmatmul.mubr.msk.bf16.vlgmr.msra.gmra.mrb[20].mxu1 %vm1897_vm2, %v2188_v35 }
 0x707   : > { %3645 = vmatpush3.bf16.msra.mxu0 %v3919_v21 }
 0x708   : > { %3646 = vmatprep.subr.bf16.mxu0 %v4615_v15 }
 0x7aa   : > { %v2226_v56 = vpop.f32.mrb[8].mxu0  ;;  %v2270_v23 = vpop.f32.mrb[16].mxu1 }
 0x7ab   : > { %v3622_v37 = vpop.f32.mrb[9].mxu0  ;;  %v3628_v34 = vpop.f32.mrb[17].mxu1 }
 0x7ac   : > { %v2229_v52 = vpop.f32.mrb[10].mxu0  ;;  %v2273_v54 = vpop.f32.mrb[18].mxu1 }
 0x7ad   : > { %v3623_v58 = vpop.f32.mrb[11].mxu0  ;;  %v3629_v41 = vpop.f32.mrb[19].mxu1 }
 0x7d5   : > { %v2314_v43 = vpop.f32.mrb[12].mxu0 }
 0x7d6   : > { %v2365_v44 = vcombine.low %v2226_v56, %v2314_v43  ;;  %v2366_v46 = vcombine.high %v2226_v56, %v2314_v43  ;;  %v3634_v47 = vpop.f32.mrb[13].mxu0 }
 0x7d7   : > { %v2317_v59 = vpop.f32.mrb[14].mxu0 }
 0x7d8   : > { %v2433_v60 = vcombine.low %v2229_v52, %v2317_v59  ;;  %v2434_v61 = vcombine.high %v2229_v52, %v2317_v59  ;;  %v3635_v38 = vpop.f32.mrb[15].mxu0  ;;  %v2373_v6 = vrot.slane %v2365_v44, %v5284_v2  ;;  %v2380_v1 = vrot.slane %v2366_v46, %v5284_v2  ;;  %v3920_v52 = vld [vmem:[#allocation14 + $0x10] sm:$0xff]  }
 0x7d9   : > { %v2358_v39 = vpop.f32.mrb[20].mxu1  ;;  %3647 = vmatpush3.bf16.msra.mxu0 %v3920_v52 }
 0x7da   : > { %v2381_v53 = vcombine.low %v2270_v23, %v2358_v39  ;;  %v2382_v0 = vcombine.high %v2270_v23, %v2358_v39  ;;  %v3640_v49 = vpop.f32.mrb[21].mxu1  ;;  %v2441_v16 = vrot.slane %v2433_v60, %v5284_v2  ;;  %v2448_v33 = vrot.slane %v2434_v61, %v5284_v2  ;;  %3648 = vmatprep.subr.bf16.mxu0 %v4615_v15 }
 0x7db   : > { %v2361_v63 = vpop.f32.mrb[22].mxu1 }
 0x7dc   : > { %v2389_v42 = vrot.slane %v2381_v53, %v5284_v2  ;;  %v2396_v5 = vrot.slane %v2382_v0, %v5284_v2  ;;  %v2449_v57 = vcombine.low %v2273_v54, %v2361_v63  ;;  %v2450_v3 = vcombine.high %v2273_v54, %v2361_v63  ;;  %v3641_v4 = vpop.f32.mrb[23].mxu1 }
 0x7de   : > { %v2397_v7 = vcombine.low %v2373_v6, %v2389_v42  ;;  %v2398_v8 = vcombine.high %v2373_v6, %v2389_v42  ;;  %v2413_v10 = vcombine.low %v2380_v1, %v2396_v5  ;;  %v2414_v11 = vcombine.high %v2380_v1, %v2396_v5  ;;  %v3921_v5 = vld [vmem:[#allocation14 + $0x18] sm:$0xff]  }
 0x7df   : > { %v2457_v40 = vrot.slane %v2449_v57, %v5284_v2  ;;  %v2464_v55 = vrot.slane %v2450_v3, %v5284_v2  ;;  %3649 = vmatpush3.bf16.msra.mxu0 %v3921_v5 }
 0x7e0   : > { %v2405_v13 = vrot.slane %v2397_v7, %v5299_v9  ;;  %v2412_v17 = vrot.slane %v2398_v8, %v5299_v9  ;;  %v2421_v18 = vrot.slane %v2413_v10, %v5299_v9  ;;  %v2428_v20 = vrot.slane %v2414_v11, %v5299_v9 }
 0x7e1   : > { %v2465_v22 = vcombine.low %v2441_v16, %v2457_v40  ;;  %v2466_v24 = vcombine.high %v2441_v16, %v2457_v40  ;;  %v2481_v25 = vcombine.low %v2448_v33, %v2464_v55  ;;  %v2482_v26 = vcombine.high %v2448_v33, %v2464_v55 }
 0x7e2   : > { %v2501_v12 = vcombine.low %v2405_v13, %v2412_v17  ;;  %v3470_v48 = vcombine.high %v2405_v13, %v2412_v17  ;;  %v2517_v14 = vcombine.low %v2421_v18, %v2428_v20  ;;  %v3471_v19 = vcombine.high %v2421_v18, %v2428_v20 }
 0x7e3   : > { %v2473_v27 = vrot.slane %v2465_v22, %v5299_v9  ;;  %v2480_v28 = vrot.slane %v2466_v24, %v5299_v9  ;;  %v2489_v29 = vrot.slane %v2481_v25, %v5299_v9  ;;  %v2496_v31 = vrot.slane %v2482_v26, %v5299_v9 }
 0x7e4   : > { %v2508_v32 = vrot.slane %v2501_v12, %v5284_v2  ;;  %v2516_v50 = vrot.slane %v3470_v48, %v5284_v2  ;;  %v2524_v51 = vrot.slane %v2517_v14, %v5284_v2  ;;  %v2532_v45 = vrot.slane %v3471_v19, %v5284_v2  ;;  %v3474_v14 = vld [vmem:[#allocation16] ss:$0 sm:$0xff] }
 0x7e5   : > { %v2569_v30 = vcombine.low %v2473_v27, %v2480_v28  ;;  %v3472_v35 = vcombine.high %v2473_v27, %v2480_v28  ;;  %v2585_v36 = vcombine.low %v2489_v29, %v2496_v31  ;;  %v3473_v21 = vcombine.high %v2489_v29, %v2496_v31  ;;  %v3480_v27 = vld [vmem:[#allocation17] ss:$0 sm:$0xff] }
 0x7e6   : > { %v2534_v56 = vcombine.high %v2508_v32, %v2516_v50  ;;  %v2550_v23 = vcombine.high %v2524_v51, %v2532_v45  ;;  %v2533_v37 = vcombine.low %v2508_v32, %v2516_v50  ;;  %v2549_v34 = vcombine.low %v2524_v51, %v2532_v45  ;;  %v3998_v45 = vld [vmem:[%s5190_s4] sm:$0xff] }
 0x7e7   : > { %v2576_v54 = vrot.slane %v2569_v30, %v5284_v2  ;;  %v2584_v58 = vrot.slane %v3472_v35, %v5284_v2  ;;  %v2592_v41 = vrot.slane %v2585_v36, %v5284_v2  ;;  %v2600_v43 = vrot.slane %v3473_v21, %v5284_v2  ;;  %v3999_v36 = vld [vmem:[%s5190_s4 + $0x8] sm:$0xff]  ;;  %s3158_s4 = sshll.u32 %s790_s28, 4  ;;  %s5621_s4 = int_to_ptr.vmem [resolvable:$true] %s3158_s4 }
 0x7e8   : > { %v2548_v44 = vrot.slane %v2534_v56, %v5299_v9  ;;  %v2564_v46 = vrot.slane %v2550_v23, %v5299_v9  ;;  %v2541_v47 = vrot.slane %v2533_v37, %v5299_v9  ;;  %v2557_v59 = vrot.slane %v2549_v34, %v5299_v9  ;;  %s4478_s27 = scalar_lea.vmem %s5621_s4, 256 }
 0x7e9   : > { %v2602_v60 = vcombine.high %v2576_v54, %v2584_v58  ;;  %v2618_v61 = vcombine.high %v2592_v41, %v2600_v43  ;;  %v2601_v38 = vcombine.low %v2576_v54, %v2584_v58  ;;  %v2617_v39 = vcombine.low %v2592_v41, %v2600_v43  ;;  %p4479_p11 = scmp.ne.s32.totalorder %s5621_s4, %s4478_s27 }
 0x7ea   : > { %v2567_v53 = vcombine.low %v2548_v44, %v2564_v46  ;;  %v2565_v0 = vcombine.low %v2541_v47, %v2557_v59  ;;  %v2566_v49 = vcombine.high %v2541_v47, %v2557_v59  ;;  %v2568_v6 = vcombine.high %v2548_v44, %v2564_v46  ;;  %v3922_v59 = vld [vmem:[#allocation22] ss:$8 sps:$4 sm:$0xff]  }
 0x7eb   : > { %v2616_v2 = vrot.slane %v2602_v60, %v5299_v9  ;;  %v2632_v1 = vrot.slane %v2618_v61, %v5299_v9  ;;  %v2609_v63 = vrot.slane %v2601_v38, %v5299_v9  ;;  %v2625_v42 = vrot.slane %v2617_v39, %v5299_v9  ;;  %v3924_v60 = vld [vmem:[#allocation22 + $0x4] ss:$8 sps:$4 sm:$0xff]   ;;  %v3927_v61 = vld [vmem:[#allocation22 + $0x14] ss:$8 sps:$4 sm:$0xff]   ;;  %v3925_v38 = vld [vmem:[#allocation22 + $0x10] ss:$8 sps:$4 sm:$0xff]   ;;  %p4480_p5 = pnand %p4479_p11, %p5758_p0 }
 0x7ec   : > { %2872 = vmatprep.subr.bf16.mxu1 %v3924_v60  ;;  %v4626_v39 = vmov 0  }
 0x7ed   : > { %v2635_v57 = vcombine.low %v2616_v2, %v2632_v1  ;;  %v2634_v3 = vcombine.high %v2609_v63, %v2625_v42  ;;  %v2633_v4 = vcombine.low %v2609_v63, %v2625_v42  ;;  %v2636_v7 = vcombine.high %v2616_v2, %v2632_v1  ;;  %2873 = vmatpush1.bf16.msra.mxu1 %v3922_v59  ;;  %p4481_p1 = pneg %p4480_p5 }
 0x7ee   : > { %2904 = vmatprep.mubr.bf16.mxu1 %v4626_v39  ;;  %2874 = vmatprep.subr.bf16.mxu1 %v3927_v61 }
 0x7ef   : > { %v3900_v8 = vpack.i.bf16 %v2635_v57, %v2567_v53  ;;  %v3895_v15 = vpack.i.bf16 %v2634_v3, %v2566_v49  ;;  %v3905_v10 = vpack.i.bf16 %v2636_v7, %v2568_v6  ;;  %v3930_v53 = vld [vmem:[#allocation22 + $0x24] ss:$8 sps:$4 sm:$0xff]   ;;  %v3933_v49 = vld [vmem:[#allocation22 + $0x34] ss:$8 sps:$4 sm:$0xff]   ;;  %v3931_v6 = vld [vmem:[#allocation22 + $0x30] ss:$8 sps:$4 sm:$0xff]  }
 0x7f0   : > { %v3481_v7 = vld [vmem:[#allocation19] ss:$0 sm:$0xff] }
 0x7f1   : > { %3901 = vrot.lane.b32.xlu1 %v3900_v8, %s4623_s29  ;;  %3896 = vrot.lane.b32.xlu0 %v3895_v15, %s4624_s1  ;;  %s4627_s29 = smov [#allocation29]  }
 0x7f2   : > { %2875 = vmatpush1.bf16.msra.mxu1 %v3925_v38  ;;  %s4482_s1 = sshll.u32 %s4627_s29, 4  ;;  %s4483_s1 = int_to_ptr.vmem [resolvable:$false] %s4482_s1 }
 0x7f3   : > { %2876 = vmatprep.subr.bf16.mxu1 %v3930_v53  ;;  %p4485_p10 = scmp.lt.s32.totalorder %s5621_s4, %s4483_s1 }
 0x7f5   : > { %3906 = vrot.lane.b32.xlu1 %v3905_v10, %s4625_s0  ;;  %s4484_s0 = scalar_lea.vmem %s4483_s1, 512 }
 0x7f6   : > { %p4486_p13 = scmp.lt.s32.totalorder %s4484_s0, %s4478_s27 }
 0x7f8   : > { %p4487_p2 = por %p4486_p13, %p4485_p10 }
 0x7fa   : > { %p4488_p8 = pnand %p4487_p2, %p4481_p1 }
 0x863   : > { %v3902_v11 = vpop.permute.xlu1 %3901  ;;  %v3897_v16 = vpop.permute.xlu0 %3896 }
 0x864   : > { %v3899_v33 = vunpack.i.h.bf16 %v3897_v16  ;;  %v3898_v40 = vunpack.i.l.bf16 %v3897_v16  ;;  %v3904_v9 = vunpack.i.h.bf16 %v3902_v11  ;;  %v3903_v55 = vunpack.i.l.bf16 %v3902_v11  ;;  %v3482_v11 = vld [vmem:[#allocation20] ss:$0 sm:$0xff] }
 0x866   : > { %v2661_v13 = vsel %vm1897_vm2, %v2565_v0, %v3898_v40  ;;  %v2662_v17 = vsel %vm1897_vm2, %v2633_v4, %v3899_v33  ;;  %v3928_v0 = vld [vmem:[#allocation22 + $0x20] ss:$8 sps:$4 sm:$0xff]  }
 0x867   : > { %v3907_v18 = vpop.permute.xlu1 %3906  ;;  %v2664_v24 = vsel %vm2663_vm4, %v2661_v13, %v3903_v55  ;;  %v2665_v25 = vsel %vm2663_vm4, %v2662_v17, %v3904_v9  ;;  %2877 = vmatpush1.bf16.msra.mxu1 %v3928_v0  ;;  %v3934_v55 = vld [vmem:[#allocation25 + $0x40] sm:$0xff]   ;;  %v3936_v17 = vld [vmem:[#allocation25 + $0x48] sm:$0xff]  }
 0x868   : > { %v3909_v20 = vunpack.i.h.bf16 %v3907_v18  ;;  %v3908_v22 = vunpack.i.l.bf16 %v3907_v18  ;;  %2878 = vmatprep.subr.bf16.mxu1 %v3933_v49  ;;  %v3935_v13 = vld [vmem:[#allocation25] sm:$0xff]   ;;  %3548 = vmatprep.subr.bf16.mxu0 %v3934_v55  ;;  %v3937_v18 = vld [vmem:[#allocation25 + $0x8] sm:$0xff]  }
 0x86a   : > { %v2667_v26 = vsel %vm2666_vm5, %v2664_v24, %v3908_v22  ;;  %v2668_v12 = vsel %vm2666_vm5, %v2665_v25, %v3909_v20  ;;  %v3938_v20 = vld [vmem:[#allocation25 + $0x50] sm:$0xff]   ;;  %v3940_v24 = vld [vmem:[#allocation25 + $0x58] sm:$0xff]  }
 0x86b   : > { %v2669_v48 = vpack.c.bf16 %v2668_v12, %v2667_v26  ;;  %2879 = vmatpush1.bf16.msra.mxu1 %v3931_v6  ;;  %v3939_v22 = vld [vmem:[#allocation25 + $0x10] sm:$0xff]   ;;  %v3941_v25 = vld [vmem:[#allocation25 + $0x18] sm:$0xff]   ;;  %v3942_v26 = vld [vmem:[#allocation25 + $0x60] sm:$0xff]  }
 0x86c   : > { %v3943_v12 = vld [vmem:[#allocation25 + $0x20] sm:$0xff]  }
 0x86d   : > { %3651 = vmatmul.mubr.msk.bf16.vlgmr.msra.gmra.mrb[16].mxu0 %vm797_vm0, %v2669_v48  ;;  %v3944_v48 = vld [vmem:[#allocation25 + $0x68] sm:$0xff]  }
 0x86e   : > { %3549 = vmatpush3.bf16.msra.mxu0 %v3935_v13 }
 0x86f   : > { %3550 = vmatprep.subr.bf16.mxu0 %v3936_v17 }
 0x872   : > { %3551 = vmatpush3.bf16.msra.mxu0 %v3937_v18 }
 0x873   : > { %3552 = vmatprep.subr.bf16.mxu0 %v3938_v20 }
 0x876   : > { %3553 = vmatpush3.bf16.msra.mxu0 %v3939_v22 }
 0x877   : > { %3554 = vmatprep.subr.bf16.mxu0 %v3940_v24  ;;  %v3492_v24 = vld [vmem:[#allocation26] ss:$0 sm:$0xff] }
 0x87a   : > { %3555 = vmatpush3.bf16.msra.mxu0 %v3941_v25 }
 0x87b   : > { %3556 = vmatprep.subr.bf16.mxu0 %v3942_v26 }
 0x87e   : > { %3557 = vmatpush3.bf16.msra.mxu0 %v3943_v12 }
 0x87f   : > { %3558 = vmatprep.subr.bf16.mxu0 %v3944_v48  ;;  %v3509_v48 = vld [vmem:[#allocation28] ss:$0 sm:$0xff] }
 0x940   : > { %v2746_v19 = vpop.f32.mrb[16].mxu0 }
 0x941   : > { %v2747_v28 = vadd.f32 %v3474_v14, %v2746_v19  ;;  %v3652_v29 = vpop.f32.mrb[17].mxu0  ;;  %v3946_v19 = vld [vmem:[#allocation25 + $0x70] sm:$0xff]  }
 0x942   : > { %v2749_v31 = vpop.f32.mrb[18].mxu0  ;;  %v3949_v29 = vld [vmem:[#allocation25 + $0x38] sm:$0xff]  }
 0x943   : > { %v2760_v32 = vmul.f32 %v3480_v27, %v2747_v28  ;;  %v2750_v50 = vadd.f32 %v3474_v14, %v2749_v31  ;;  %v3653_v51 = vpop.f32.mrb[19].mxu0  ;;  %v3945_v14 = vld [vmem:[#allocation25 + $0x28] sm:$0xff]   ;;  %v3948_v28 = vld [vmem:[#allocation25 + $0x78] sm:$0xff]   ;;  %v2821_v31 = vsub.s32 0, %v5277_v62 }
 0x944   : > { %3559 = vmatpush3.bf16.msra.mxu0 %v3945_v14 }
 0x945   : > { %v5596_v30 = vadd.f32 %v3998_v45, %v2760_v32  ;;  %v2761_v35 = vmul.f32 %v3480_v27, %v2750_v50  ;;  %v3947_v27 = vld [vmem:[#allocation25 + $0x30] sm:$0xff]   ;;  %3560 = vmatprep.subr.bf16.mxu0 %v3946_v19  ;;  %v2817_v32 = vld [vmem:[#allocation23] sm:$0x3]  ;;  %v2825_v50 = vsub.s32 1, %v5277_v62 }
 0x946   : > { %v2822_v51 = vrot.slane %v2817_v32, %v2821_v31 }
 0x947   : > { %v5599_v21 = vadd.f32 %v3999_v36, %v2761_v35  ;;  %v2766_v56 = vsel %vm797_vm0, %v5596_v30, 0.0  ;;  %v2826_v45 = vrot.slane %v2817_v32, %v2825_v50 }
 0x948   : > { %2767 = vadd.xlane.f32.xlu1 %v2766_v56  ;;  %3561 = vmatpush3.bf16.msra.mxu0 %v3947_v27 }
 0x949   : > { %v2769_v23 = vsel %vm797_vm0, %v5599_v21, 0.0  ;;  %3562 = vmatprep.subr.bf16.mxu0 %v3948_v28 }
 0x94a   : > { %2770 = vadd.xlane.f32.xlu0 %v2769_v23 }
 0x94c   : > { %3563 = vmatpush3.bf16.msra.mxu0 %v3949_v29 }
 0x9d5   : > { %v2768_v37 = vpop.xlane.xlu1 %2767 }
 0x9d6   : > { %v2772_v34 = vmul.f32 0.015625, %v2768_v37 }
 0x9d7   : > { %v2771_v52 = vpop.xlane.xlu0 %2770 }
 0x9d8   : > { %v2774_v54 = vsub.f32 %v5596_v30, %v2772_v34  ;;  %v2773_v58 = vmul.f32 0.015625, %v2771_v52 }
 0x9da   : > { %v2775_v41 = vsub.f32 %v5599_v21, %v2773_v58  ;;  %v2776_v43 = vmul.f32 %v2774_v54, %v2774_v54 }
 0x9dc   : > { %v2778_v44 = vsel %vm797_vm0, %v2776_v43, 0.0  ;;  %v2777_v46 = vmul.f32 %v2775_v41, %v2775_v41 }
 0x9dd   : > { %2779 = vadd.xlane.f32.xlu0 %v2778_v44 }
 0x9de   : > { %v2781_v47 = vsel %vm797_vm0, %v2777_v46, 0.0 }
 0x9e1   : > { %2782 = vadd.xlane.f32.xlu0 %v2781_v47 }
 0xa6a   : > { %v2780_v2 = vpop.xlane.xlu0 %2779 }
 0xa6b   : > { %v2784_v1 = vmul.f32 0.015625, %v2780_v2 }
 0xa6d   : > { %v2786_v63 = vadd.f32 1e-06, %v2784_v1 }
 0xa6e   : > { %v2783_v42 = vpop.xlane.xlu0 %2782 }
 0xa6f   : > { %3986 = vrsqrt.f32 %v2786_v63  ;;  %v2785_v5 = vmul.f32 0.015625, %v2783_v42 }
 0xa71   : > { %v2787_v57 = vadd.f32 1e-06, %v2785_v5 }
 0xa73   : > { %3988 = vrsqrt.f32 %v2787_v57 }
 0xa79   : > { %v3987_v3 = vpop.eup %3986 }
 0xa7a   : > { %v2790_v4 = vmul.f32 %v3987_v3, %v2774_v54 }
 0xa7c   : > { %v2798_v15 = vmul.f32 %v3481_v7, %v2790_v4 }
 0xa7d   : > { %v3989_v8 = vpop.eup %3988 }
 0xa7e   : > { %v2791_v10 = vmul.f32 %v3989_v8, %v2775_v41  ;;  %v2806_v33 = vadd.f32 %v3482_v11, %v2798_v15 }
 0xa80   : > { %v2799_v16 = vmul.f32 %v3481_v7, %v2791_v10 }
 0xa82   : > { %v2807_v40 = vadd.f32 %v3482_v11, %v2799_v16 }
 0xa84   : > { %v2808_v9 = vpack.c.bf16 %v2807_v40, %v2806_v33 }
 0xa86   : > { %3491 = vmatmul.mubr.msk.bf16.vlgmr.msra.gmra.mrb[24].mxu1 %vm797_vm0, %v2808_v9 }
 0xb59   : > { %v2906_v35 = vpop.f32.mrb[24].mxu1 }
 0xb5a   : > { %v2907_v36 = vadd.f32 %v2906_v35, %v2822_v51  ;;  %v2908_v56 = vpop.f32.mrb[25].mxu1 }
 0xb5b   : > { %v2909_v23 = vadd.f32 %v2908_v56, %v2826_v45  ;;  %v2910_v37 = vpop.f32.mrb[26].mxu1 }
 0xb5c   : > { %v2915_v34 = vmul.f32 %v2907_v36, %v2907_v36  ;;  %v2911_v52 = vadd.f32 %v2910_v37, %v2822_v51  ;;  %v2912_v54 = vpop.f32.mrb[27].mxu1 }
 0xb5d   : > { %v2916_v58 = vmul.f32 %v2909_v23, %v2909_v23  ;;  %v2913_v41 = vadd.f32 %v2912_v54, %v2826_v45 }
 0xb5e   : > { %v2919_v43 = vmul.f32 %v2915_v34, %v2907_v36  ;;  %v2917_v44 = vmul.f32 %v2911_v52, %v2911_v52 }
 0xb5f   : > { %v2920_v46 = vmul.f32 %v2916_v58, %v2909_v23  ;;  %v2918_v47 = vmul.f32 %v2913_v41, %v2913_v41 }
 0xb60   : > { %v2923_v59 = vmul.f32 0.044715, %v2919_v43  ;;  %v2921_v60 = vmul.f32 %v2917_v44, %v2911_v52 }
 0xb61   : > { %v2924_v61 = vmul.f32 0.044715, %v2920_v46  ;;  %v2922_v62 = vmul.f32 %v2918_v47, %v2913_v41 }
 0xb62   : > { %v2927_v38 = vadd.f32 %v2923_v59, %v2907_v36  ;;  %v2925_v39 = vmul.f32 0.044715, %v2921_v60 }
 0xb63   : > { %v2928_v53 = vadd.f32 %v2924_v61, %v2909_v23  ;;  %v2926_v0 = vmul.f32 0.044715, %v2922_v62 }
 0xb64   : > { %v2931_v49 = vmul.f32 0.7978846, %v2927_v38  ;;  %v2929_v6 = vadd.f32 %v2925_v39, %v2911_v52 }
 0xb65   : > { %v2932_v2 = vmul.f32 0.7978846, %v2928_v53  ;;  %v2930_v1 = vadd.f32 %v2926_v0, %v2913_v41 }
 0xb66   : > { %3990 = vtanh.f32 %v2931_v49  ;;  %v2933_v63 = vmul.f32 0.7978846, %v2929_v6 }
 0xb67   : > { %3992 = vtanh.f32 %v2932_v2  ;;  %v2934_v42 = vmul.f32 0.7978846, %v2930_v1 }
 0xb68   : > { %3994 = vtanh.f32 %v2933_v63 }
 0xb69   : > { %3996 = vtanh.f32 %v2934_v42 }
 0xb70   : > { %v3991_v5 = vpop.eup %3990 }
 0xb71   : > { %v3993_v57 = vpop.eup %3992  ;;  %v2939_v3 = vadd.f32 1.0, %v3991_v5 }
 0xb72   : > { %v3995_v4 = vpop.eup %3994  ;;  %v2940_v7 = vadd.f32 1.0, %v3993_v57 }
 0xb73   : > { %v3997_v8 = vpop.eup %3996  ;;  %v2943_v15 = vmul.f32 0.5, %v2939_v3  ;;  %v2941_v10 = vadd.f32 1.0, %v3995_v4 }
 0xb74   : > { %v2942_v11 = vadd.f32 1.0, %v3997_v8  ;;  %v2944_v16 = vmul.f32 0.5, %v2940_v7 }
 0xb75   : > { %v2945_v33 = vmul.f32 0.5, %v2941_v10  ;;  %v2947_v9 = vmul.f32 %v2943_v15, %v2907_v36 }
 0xb76   : > { %v2946_v40 = vmul.f32 0.5, %v2942_v11  ;;  %v2948_v13 = vmul.f32 %v2944_v16, %v2909_v23 }
 0xb77   : > { %v2949_v55 = vmul.f32 %v2945_v33, %v2911_v52 }
 0xb78   : > { %v2950_v17 = vmul.f32 %v2946_v40, %v2913_v41 }
 0xb79   : > { %v2951_v18 = vpack.c.bf16 %v2949_v55, %v2947_v9 }
 0xb7a   : > { %v2952_v20 = vpack.c.bf16 %v2950_v17, %v2948_v13 }
 0xb7c   : > { %3120 = vmatprep.mubr.bf16.mxu0 %v2952_v20 }
 0xb7d   : > { %3121 = vmatmul.mubr.bf16.vlgmr.msra.gmra.mrb[20].mxu0 %v2951_v18 }
 0xc50   : > { %v3564_v22 = vpop.f32.mrb[20].mxu0 }
 0xc51   : > { %v3565_v25 = vpop.f32.mrb[21].mxu0 }
 0xc52   : > { %v3566_v26 = vadd.f32 %v3565_v25, %v3564_v22  ;;  %v3567_v12 = vpop.f32.mrb[22].mxu0 }
 0xc53   : > { %v3568_v14 = vpop.f32.mrb[23].mxu0 }
 0xc54   : > { %v3123_v19 = vadd.f32 %v3566_v26, %v3492_v24  ;;  %v3569_v27 = vadd.f32 %v3568_v14, %v3567_v12 }
 0xc56   : > { %v3136_v28 = vmul.f32 %v3509_v48, %v3123_v19  ;;  %v3126_v29 = vadd.f32 %v3569_v27, %v3492_v24 }
 0xc58   : > { %v3138_v31 = vadd.f32 %v3136_v28, %v5596_v30  ;;  %v3137_v32 = vmul.f32 %v3509_v48, %v3126_v29 }
 0xc5a   : > { %3140 = vst.msk [vmem:[%s790_s28] sm:$0xff] %vm797_vm0, %v3138_v31  ;;  %v3139_v50 = vadd.f32 %v3137_v32, %v5599_v21 }
 0xc5c   : > { %3141 = vst.msk [vmem:[%s790_s28 + $0x8] sm:$0xff] %vm797_vm0, %v3139_v50 }
 0xc5d   : > { %4491 = shalt.err (!%p4488_p8)
}
 0xc5e   : > { %s4492_s20 = scalar_lea.hbm %s5619_s3, 256  ;;  %s4496_s2 = scalar_lea.hbm %s5757_s22, 512 }
 0xc5f   : > { %p4493_p9 = scmp.ne.s32.totalorder %s5619_s3, %s4492_s20  ;;  %p4497_p3 = scmp.lt.u32.totalorder %s5619_s3, %s5757_s22 }
 0xc60   : > { %p4498_p7 = scmp.lt.u32.totalorder %s4496_s2, %s4492_s20  ;;  %p4500_p11 = scmp.lt.u32.totalorder %s4492_s20, %s5619_s3 }
 0xc61   : > { %p4494_p4 = pnand %p4493_p9, %p5758_p0 }
 0xc62   : > { %p4499_p12 = por %p4498_p7, %p4497_p3 }
 0xc63   : > { %p4495_p6 = pneg %p4494_p4 }
 0xc64   : > { %p4501_p5 = por %p4500_p11, %p4499_p12 }
 0xc66   : > { %p4502_p1 = pnand %p4501_p5, %p4495_p6 }
 0xc68   : > { %4505 = shalt.err (!%p4502_p1)
}
 0xc69   : > { %s4628_s27 = smov 128   ;;  %s4629_s1 = smov 8  }
 0xc6a   : > { %3720 = dma.vmem_to_hbm [thread:$0]  (%p5758_p0), %s5621_s4, 256, %s5619_s3, %s3143_s21, %s4628_s27, %s4628_s27, %s4629_s1  }
 0xc6b PF: > { %s5759_s0 = sld [smem:[#allocation40_spill]]  ;;  %s5760_s25 = sld [smem:[#allocation45_spill]] }
 0xc6c   : > { %p5761_p10 = scmp.ne.s32.totalorder %s5746_s24, 0 }
 0xc71   : > { %s3173_s28 = sand.u32 1, %s5759_s0   ;;  %p5762_p13 = scmp.ge.s32.totalorder %s5760_s25, 2 }
 0xc72   : > { %s3174_s20 = scalar_lea.sflag [#allocation4], %s3173_s28 }
 0xc73   : > { %p3776_p2 = pnand %p5762_p13, %p5761_p10 }
 0xc75   : > { %4567 = dma.done.wait (!%p3776_p2), %s3174_s20, 256  }
 0xc76   : > { %4569 = vsyncadd (!%p3776_p2), %s3174_s20, 4294967040  ;;  %s41_s29 = sadd.s32 1, %s5760_s25   ;;  %s5763_s24 = sld [smem:[#allocation41_spill]] }
 0xc77   : > { %p38_p8 = scmp.ge.s32.totalorder %s41_s29, 4   ;;  %s5764_s25 = sld [smem:[#allocation42_spill]] }
 0xc78   : > { %s5765_s27 = sld [smem:[#allocation44_spill]]  ;;  %s5766_s26 = smov %s5128_s30 }
 0xc79   : > { %s5767_s28 = smov %s5769_s19  ;;  %40 = sbr.rel (!%p38_p8) target bundleno = 21 (0x15), region = 197 }
 0xc80   :  { %3179 = vsyncpa [#allocation3], 1 }
 0xc81   :  { %3181 = vsyncpa [#allocation3 + $0x1], 1 }
 0xc82   :  { %3182 = vsyncpa [#allocation6], 1 }
 0xc83   :  { %3183 = vsyncpa [#allocation9], 1 }
 0xc84   :  { %3184 = vsyncpa [#allocation12], 1 }
 0xc85   :  { %3185 = vsyncpa [#allocation15], 1 }
 0xc86   :  { %3186 = vsyncpa [#allocation18], 1 }
 0xc87   :  { %3187 = vsyncpa [#allocation21], 1 }
 0xc88   :  { %3188 = vsyncpa [#allocation24], 1 }
 0xc89   :  { %3189 = vsyncpa [#allocation27], 1 }
 0xc8a   :  { %3190 = vsyncpa [#allocation4], 1 }
 0xc8b   :  { %3192 = vsyncpa [#allocation4 + $0x1], 1 }

</bundles_post_ra>
